<compile_context>
chip_gen: v7x
topology: tpu7x:2x2x1
jax: 0.10.0
libtpu: 0.0.40
codegen_flags: <defaults>
</compile_context>

<pallas_src>
import jax
import jax.numpy as jnp
from jax import lax
from jax.experimental import pallas as pl
from jax.experimental.pallas import tpu as pltpu

SuperNetSetting = [
    [4, 8, 12, 16], [4, 8, 12, 16], [4, 8, 12, 16], [4, 8, 12, 16],
    [4, 8, 12, 16], [4, 8, 12, 16], [4, 8, 12, 16],
    [4, 8, 12, 16, 20, 24, 28, 32], [4, 8, 12, 16, 20, 24, 28, 32],
    [4, 8, 12, 16, 20, 24, 28, 32], [4, 8, 12, 16, 20, 24, 28, 32],
    [4, 8, 12, 16, 20, 24, 28, 32], [4, 8, 12, 16, 20, 24, 28, 32],
    [4, 8, 12, 16, 20, 24, 28, 32, 36, 40, 44, 48, 52, 56, 60, 64],
    [4, 8, 12, 16, 20, 24, 28, 32, 36, 40, 44, 48, 52, 56, 60, 64],
    [4, 8, 12, 16, 20, 24, 28, 32, 36, 40, 44, 48, 52, 56, 60, 64],
    [4, 8, 12, 16, 20, 24, 28, 32, 36, 40, 44, 48, 52, 56, 60, 64],
    [4, 8, 12, 16, 20, 24, 28, 32, 36, 40, 44, 48, 52, 56, 60, 64],
    [4, 8, 12, 16, 20, 24, 28, 32, 36, 40, 44, 48, 52, 56, 60, 64],
    [4, 8, 12, 16, 20, 24, 28, 32, 36, 40, 44, 48, 52, 56, 60, 64],
]

EPS = 1e-5
LANES = 128


def _round_up(v, m):
    return (v + m - 1) // m * m


# --------------------------- fused Pallas kernel ---------------------------

def _make_block_kernel(*, N, Ho, Wo, stride, cin, cmid, cpad, has_conv_shortcut):
    """Builds the fused BasicBlock kernel for one static configuration."""
    s = stride
    nphase = s * s
    M = N * Ho * Wo
    inv_m = 1.0 / float(M)

    def bn_scale_shift(acc, gain_ref, bias_ref=None):
        # Batch-stat BN (biased var) folded with the per-channel gain (mask or
        # mask-less affine gamma) into one scale/shift: acc*scale + shift.
        mean = jnp.sum(acc, axis=0, keepdims=True) * inv_m
        var = jnp.sum(acc * acc, axis=0, keepdims=True) * inv_m - mean * mean
        scale = lax.rsqrt(var + EPS) * gain_ref[...]
        shift = -mean * scale
        if bias_ref is not None:
            shift = shift + bias_ref[...]
        return acc * scale + shift

    def kernel(*refs):
        it = iter(refs)
        xph = [next(it) for _ in range(nphase)]   # input phases (f32, padded)
        w1_ref = next(it)                         # (9, cin, cmid) bf16
        w2_ref = next(it)                         # (9, cmid, cpad) bf16
        mask1_ref = next(it)                      # (1, cmid) f32
        mask2_ref = next(it)                      # (1, cpad) f32
        if has_conv_shortcut:
            wsc_ref = next(it)                    # (cin, cpad) bf16
            gsc_ref = next(it)                    # (1, cpad) f32
            bsc_ref = next(it)                    # (1, cpad) f32
        else:
            res_ref = next(it)                    # (M, cpad) f32 identity residual
        o_ref = next(it)                          # (M, cpad) f32 output
        o1p_ref = next(it)                        # VMEM scratch (N,Ho+2,Wo+2,cmid)

        # Load each input phase once; tap windows are static unit-stride slices.
        xv = [r[...] for r in xph]

        # ---- conv1: 3x3 / stride s as 9 shifted-slice matmuls (bf16 MXU, f32 acc)
        acc1 = jnp.zeros((M, cmid), jnp.float32)
        for dy in range(3):
            for dx in range(3):
                ph = (dy % s) * s + (dx % s)
                oy, ox = dy // s, dx // s
                xt = xv[ph][:, oy:oy + Ho, ox:ox + Wo, :]
                xt = xt.reshape(M, cin).astype(jnp.bfloat16)
                acc1 = acc1 + jnp.dot(xt, w1_ref[dy * 3 + dx],
                                      preferred_element_type=jnp.float32)

        # ---- BN(batch stats) folded with mixed channel mask, then ReLU
        out1 = jnp.maximum(bn_scale_shift(acc1, mask1_ref), 0.0)

        # ---- keep conv1 output (with zero halo for the 3x3 conv2) in VMEM
        o1p_ref[...] = jnp.zeros_like(o1p_ref)
        o1p_ref[:, 1:Ho + 1, 1:Wo + 1, :] = out1.reshape(N, Ho, Wo, cmid)
        o1v = o1p_ref[...]

        # ---- conv2: 3x3 / stride 1 as 9 shifted-slice matmuls
        acc2 = jnp.zeros((M, cpad), jnp.float32)
        for dy in range(3):
            for dx in range(3):
                pt = o1v[:, dy:dy + Ho, dx:dx + Wo, :]
                pt = pt.reshape(M, cmid).astype(jnp.bfloat16)
                acc2 = acc2 + jnp.dot(pt, w2_ref[dy * 3 + dx],
                                      preferred_element_type=jnp.float32)
        main = bn_scale_shift(acc2, mask2_ref)

        # ---- shortcut
        if has_conv_shortcut:
            sc_ph = (1 % s) * s + (1 % s)
            sc_off = (1 - (1 % s)) // s
            xs = xv[sc_ph][:, sc_off:sc_off + Ho, sc_off:sc_off + Wo, :]
            xs = xs.reshape(M, cin).astype(jnp.bfloat16)
            accs = jnp.dot(xs, wsc_ref[...], preferred_element_type=jnp.float32)
            sc = bn_scale_shift(accs, gsc_ref, bsc_ref)     # affine BN shortcut
        else:
            sc = res_ref[...]                               # identity shortcut

        # ---- residual add + ReLU; cpad is a multiple of 128 -> lane-dense store
        o_ref[...] = jnp.maximum(main + sc, 0.0)

    return kernel


# ------------------------------ JAX wrapper --------------------------------

def build_masks(layer_id):
    opts = SuperNetSetting[layer_id]
    cmax = opts[-1]
    rows = [jnp.concatenate([jnp.ones((ch,), jnp.float32),
                             jnp.zeros((cmax - ch,), jnp.float32)])
            for ch in opts]
    return jnp.stack(rows)  # (num_options, cmax)


class BasicBlockPallas:
    """Pallas implementation of BasicBlock (SameShortCut=False, eval mode)."""

    def __init__(self, key, len_list, ind, stride=1):
        self.ind = ind
        self.stride = stride
        cin, cmid, cout = len_list[ind - 1], len_list[ind], len_list[ind + 1]
        assert cmid == SuperNetSetting[ind][-1]
        assert cout == SuperNetSetting[ind + 1][-1]
        self.cin, self.cmid, self.cout = cin, cmid, cout
        self.cpad = _round_up(cout, LANES)

        k1, k2, k3, k4, k5 = jax.random.split(key, 5)
        self.w1 = 0.1 * jax.random.normal(k1, (cmid, cin, 3, 3), jnp.float32)
        self.w2 = 0.1 * jax.random.normal(k2, (cout, cmid, 3, 3), jnp.float32)
        self.has_conv_shortcut = (stride == 2) or (cin != cout)
        if self.has_conv_shortcut:
            self.wsc = 0.1 * jax.random.normal(k3, (cout, cin, 1, 1), jnp.float32)
            self.gamma_sc = 1.0 + 0.1 * jax.random.normal(k4, (cout,), jnp.float32)
            self.beta_sc = 0.1 * jax.random.normal(k5, (cout,), jnp.float32)
        else:
            assert cin == cout

        # Pre-packed matmul weights: (kh, kw, Cin, Cout) tap order, bf16 for the
        # MXU; conv2/shortcut output channels zero-padded to 128 lanes.
        pad_o = self.cpad - cout
        self.w1m = (jnp.transpose(self.w1, (2, 3, 1, 0))
                    .reshape(9, cin, cmid).astype(jnp.bfloat16))
        self.w2m = jnp.pad(
            jnp.transpose(self.w2, (2, 3, 1, 0)).reshape(9, cmid, cout),
            ((0, 0), (0, 0), (0, pad_o))).astype(jnp.bfloat16)
        if self.has_conv_shortcut:
            self.wscm = jnp.pad(self.wsc[:, :, 0, 0].T,
                                ((0, 0), (0, pad_o))).astype(jnp.bfloat16)
            self.gamma_p = jnp.pad(self.gamma_sc, (0, pad_o)).reshape(1, self.cpad)
            self.beta_p = jnp.pad(self.beta_sc, (0, pad_o)).reshape(1, self.cpad)

        self.masks1 = build_masks(ind)        # (opts1, cmid)
        self.masks2 = build_masks(ind + 1)    # (opts2, cout)

    def _mixed_mask(self, masks, layer_id, weight, lenth):
        if lenth is None:
            return jnp.dot(weight, masks)     # (Cmax,)
        index = SuperNetSetting[layer_id].index(lenth)
        return masks[index]

    def __call__(self, x_nchw, weight1, weight2, lenth1=None, lenth2=None):
        x = jnp.transpose(x_nchw, (0, 2, 3, 1)).astype(jnp.float32)   # NHWC
        N, H, W, _ = x.shape
        s = self.stride
        Ho = (H - 1) // s + 1
        Wo = (W - 1) // s + 1
        M = N * Ho * Wo

        mask1 = self._mixed_mask(self.masks1, self.ind, weight1, lenth1)
        mask2 = self._mixed_mask(self.masks2, self.ind + 1, weight2, lenth2)
        mask1 = mask1.reshape(1, self.cmid).astype(jnp.float32)
        mask2p = jnp.pad(mask2, (0, self.cpad - self.cout)).reshape(1, self.cpad)
        mask2p = mask2p.astype(jnp.float32)

        # Zero-pad (pad=1) and, for stride 2, split into 2x2 phases so every
        # in-kernel tap window is a unit-stride slice.
        xp = jnp.pad(x, ((0, 0), (1, 1), (1, 1), (0, 0)))
        if s == 1:
            phases = [xp]
        else:
            assert (H + 2) % s == 0 and (W + 2) % s == 0
            phases = [xp[:, dy::s, dx::s, :] for dy in range(s) for dx in range(s)]

        args = list(phases) + [self.w1m, self.w2m, mask1, mask2p]
        if self.has_conv_shortcut:
            args += [self.wscm, self.gamma_p, self.beta_p]
        else:
            res = jnp.pad(x.reshape(M, self.cin),
                          ((0, 0), (0, self.cpad - self.cout)))
            args += [res]

        kernel = _make_block_kernel(
            N=N, Ho=Ho, Wo=Wo, stride=s, cin=self.cin, cmid=self.cmid,
            cpad=self.cpad, has_conv_shortcut=self.has_conv_shortcut)

        vspec = pl.BlockSpec(memory_space=pltpu.MemorySpace.VMEM)
        out = pl.pallas_call(
            kernel,
            out_shape=jax.ShapeDtypeStruct((M, self.cpad), jnp.float32),
            in_specs=[vspec] * len(args),
            out_specs=vspec,
            scratch_shapes=[pltpu.VMEM((N, Ho + 2, Wo + 2, self.cmid),
                                       jnp.float32)],
        )(*args)

        out = out[:, :self.cout].reshape(N, Ho, Wo, self.cout)
        return jnp.transpose(out, (0, 3, 1, 2))              # back to NCHW

    # Pure-JAX reference (XLA convs, f32), for numerical validation only.
    def reference(self, x_nchw, weight1, weight2, lenth1=None, lenth2=None):
        def conv(x, w, stride, pad):
            return lax.conv_general_dilated(
                x, jnp.transpose(w, (2, 3, 1, 0)), (stride, stride),
                [(pad, pad), (pad, pad)],
                dimension_numbers=("NHWC", "HWIO", "NHWC"))

        def bn(y):
            mean = y.mean(axis=(0, 1, 2), keepdims=True)
            var = ((y - mean) ** 2).mean(axis=(0, 1, 2), keepdims=True)
            return (y - mean) * lax.rsqrt(var + EPS)

        x = jnp.transpose(x_nchw, (0, 2, 3, 1)).astype(jnp.float32)
        mask1 = self._mixed_mask(self.masks1, self.ind, weight1, lenth1)
        mask2 = self._mixed_mask(self.masks2, self.ind + 1, weight2, lenth2)
        out = jnp.maximum(bn(conv(x, self.w1, self.stride, 1)) * mask1, 0.0)
        out = bn(conv(out, self.w2, 1, 1)) * mask2
        if self.has_conv_shortcut:
            sc = bn(conv(x, self.wsc, self.stride, 0)) * self.gamma_sc + self.beta_sc
        else:
            sc = x
        out = jnp.maximum(out + sc, 0.0)
        return jnp.transpose(out, (0, 3, 1, 2))


# --------------------------------- main ------------------------------------

if __name__ == "__main__":
    key = jax.random.PRNGKey(0)
    kx1, kx2, kp1, kp2, kw = jax.random.split(key, 5)

    len_list = [opts[-1] for opts in SuperNetSetting]   # max-width sample

    # Block A: stage-2 entry block of resnet20 (16 -> 32 ch, stride 2, conv shortcut).
    blockA = BasicBlockPallas(kp1, len_list, 7, stride=2)
    xA = jax.random.normal(kx1, (2, len_list[6], 16, 16), jnp.float32)   # NCHW
    w1A = jax.nn.softmax(jax.random.normal(jax.random.fold_in(kw, 0),
                                           (len(SuperNetSetting[7]),)))
    w2A = jax.nn.softmax(jax.random.normal(jax.random.fold_in(kw, 1),
                                           (len(SuperNetSetting[8]),)))

    # Block B: stage-2 inner block (32 -> 32 ch, stride 1, identity shortcut).
    blockB = BasicBlockPallas(kp2, len_list, 9, stride=1)
    xB = jax.random.normal(kx2, (2, len_list[8], 16, 16), jnp.float32)   # NCHW
    w1B = jax.nn.softmax(jax.random.normal(jax.random.fold_in(kw, 2),
                                           (len(SuperNetSetting[9]),)))
    w2B = jax.nn.softmax(jax.random.normal(jax.random.fold_in(kw, 3),
                                           (len(SuperNetSetting[10]),)))

    for blk, x, w1, w2 in ((blockA, xA, w1A, w2A), (blockB, xB, w1B, w2B)):
        out = jax.block_until_ready(blk(x, w1, w2))
        ref = blk.reference(x, w1, w2)
        # bf16 MXU operands -> slightly looser tolerance than pure f32.
        if not jnp.allclose(out, ref, atol=3e-2, rtol=3e-2):
            raise AssertionError(
                "mismatch vs reference, max abs diff = "
                f"{float(jnp.max(jnp.abs(out - ref)))}")

    print("KERNEL_OK")
</pallas_src>

<mosaic_0001>
module attributes {stable_mosaic.version = 11 : i64} {
  func.func @kernel(%arg0: memref<2x9x9x16xf32, #tpu.memory_space<vmem>>, %arg1: memref<2x9x9x16xf32, #tpu.memory_space<vmem>>, %arg2: memref<2x9x9x16xf32, #tpu.memory_space<vmem>>, %arg3: memref<2x9x9x16xf32, #tpu.memory_space<vmem>>, %arg4: memref<9x16x32xbf16, #tpu.memory_space<vmem>>, %arg5: memref<9x32x128xbf16, #tpu.memory_space<vmem>>, %arg6: memref<1x32xf32, #tpu.memory_space<vmem>>, %arg7: memref<1x128xf32, #tpu.memory_space<vmem>>, %arg8: memref<16x128xbf16, #tpu.memory_space<vmem>>, %arg9: memref<1x128xf32, #tpu.memory_space<vmem>>, %arg10: memref<1x128xf32, #tpu.memory_space<vmem>>, %arg11: memref<128x128xf32, #tpu.memory_space<vmem>>, %arg12: memref<2x10x10x32xf32, #tpu.memory_space<vmem>>) attributes {dimension_semantics = [], scalar_prefetch = 0 : i64, scratch_operands = 1 : i64, tpu.core_type = #tpu.core_type<tc>} {
    %c0 = arith.constant 0 : index
    %c0_0 = arith.constant 0 : index
    %c0_1 = arith.constant 0 : index
    %c0_2 = arith.constant 0 : index
    %0 = vector.load %arg0[%c0, %c0_0, %c0_1, %c0_2] : memref<2x9x9x16xf32, #tpu.memory_space<vmem>>, vector<2x9x9x16xf32>
    %c0_3 = arith.constant 0 : index
    %c0_4 = arith.constant 0 : index
    %c0_5 = arith.constant 0 : index
    %c0_6 = arith.constant 0 : index
    %1 = vector.load %arg1[%c0_3, %c0_4, %c0_5, %c0_6] : memref<2x9x9x16xf32, #tpu.memory_space<vmem>>, vector<2x9x9x16xf32>
    %c0_7 = arith.constant 0 : index
    %c0_8 = arith.constant 0 : index
    %c0_9 = arith.constant 0 : index
    %c0_10 = arith.constant 0 : index
    %2 = vector.load %arg2[%c0_7, %c0_8, %c0_9, %c0_10] : memref<2x9x9x16xf32, #tpu.memory_space<vmem>>, vector<2x9x9x16xf32>
    %c0_11 = arith.constant 0 : index
    %c0_12 = arith.constant 0 : index
    %c0_13 = arith.constant 0 : index
    %c0_14 = arith.constant 0 : index
    %3 = vector.load %arg3[%c0_11, %c0_12, %c0_13, %c0_14] : memref<2x9x9x16xf32, #tpu.memory_space<vmem>>, vector<2x9x9x16xf32>
    %cst = arith.constant 0.000000e+00 : f32
    %4 = vector.broadcast %cst : f32 to vector<128x32xf32>
    %5 = vector.extract_strided_slice %0 {offsets = [0, 0, 0, 0], sizes = [2, 8, 8, 16], strides = [1, 1, 1, 1]} : vector<2x9x9x16xf32> to vector<2x8x8x16xf32>
    %6 = vector.shape_cast %5 : vector<2x8x8x16xf32> to vector<128x16xf32>
    %7 = arith.truncf %6 : vector<128x16xf32> to vector<128x16xbf16>
    %c0_15 = arith.constant 0 : index
    %c0_16 = arith.constant 0 : index
    %c0_17 = arith.constant 0 : index
    %8 = vector.load %arg4[%c0_15, %c0_16, %c0_17] : memref<9x16x32xbf16, #tpu.memory_space<vmem>>, vector<1x16x32xbf16>
    %9 = vector.shape_cast %8 : vector<1x16x32xbf16> to vector<16x32xbf16>
    %cst_18 = arith.constant dense<0.000000e+00> : vector<128x32xf32>
    %10 = tpu.matmul %7, %9, %cst_18 {dimension_numbers = #tpu.dot_dimension_numbers<[1], [0], [0], [1], [0, 0, 1, 1], [], []>} : vector<128x16xbf16>, vector<16x32xbf16>, vector<128x32xf32> -> vector<128x32xf32>
    %11 = arith.addf %4, %10 : vector<128x32xf32>
    %12 = vector.extract_strided_slice %1 {offsets = [0, 0, 0, 0], sizes = [2, 8, 8, 16], strides = [1, 1, 1, 1]} : vector<2x9x9x16xf32> to vector<2x8x8x16xf32>
    %13 = vector.shape_cast %12 : vector<2x8x8x16xf32> to vector<128x16xf32>
    %14 = arith.truncf %13 : vector<128x16xf32> to vector<128x16xbf16>
    %c1 = arith.constant 1 : index
    %c0_19 = arith.constant 0 : index
    %c0_20 = arith.constant 0 : index
    %15 = vector.load %arg4[%c1, %c0_19, %c0_20] : memref<9x16x32xbf16, #tpu.memory_space<vmem>>, vector<1x16x32xbf16>
    %16 = vector.shape_cast %15 : vector<1x16x32xbf16> to vector<16x32xbf16>
    %cst_21 = arith.constant dense<0.000000e+00> : vector<128x32xf32>
    %17 = tpu.matmul %14, %16, %cst_21 {dimension_numbers = #tpu.dot_dimension_numbers<[1], [0], [0], [1], [0, 0, 1, 1], [], []>} : vector<128x16xbf16>, vector<16x32xbf16>, vector<128x32xf32> -> vector<128x32xf32>
    %18 = arith.addf %11, %17 : vector<128x32xf32>
    %19 = vector.extract_strided_slice %0 {offsets = [0, 0, 1, 0], sizes = [2, 8, 8, 16], strides = [1, 1, 1, 1]} : vector<2x9x9x16xf32> to vector<2x8x8x16xf32>
    %20 = vector.shape_cast %19 : vector<2x8x8x16xf32> to vector<128x16xf32>
    %21 = arith.truncf %20 : vector<128x16xf32> to vector<128x16xbf16>
    %c2 = arith.constant 2 : index
    %c0_22 = arith.constant 0 : index
    %c0_23 = arith.constant 0 : index
    %22 = vector.load %arg4[%c2, %c0_22, %c0_23] : memref<9x16x32xbf16, #tpu.memory_space<vmem>>, vector<1x16x32xbf16>
    %23 = vector.shape_cast %22 : vector<1x16x32xbf16> to vector<16x32xbf16>
    %cst_24 = arith.constant dense<0.000000e+00> : vector<128x32xf32>
    %24 = tpu.matmul %21, %23, %cst_24 {dimension_numbers = #tpu.dot_dimension_numbers<[1], [0], [0], [1], [0, 0, 1, 1], [], []>} : vector<128x16xbf16>, vector<16x32xbf16>, vector<128x32xf32> -> vector<128x32xf32>
    %25 = arith.addf %18, %24 : vector<128x32xf32>
    %26 = vector.extract_strided_slice %2 {offsets = [0, 0, 0, 0], sizes = [2, 8, 8, 16], strides = [1, 1, 1, 1]} : vector<2x9x9x16xf32> to vector<2x8x8x16xf32>
    %27 = vector.shape_cast %26 : vector<2x8x8x16xf32> to vector<128x16xf32>
    %28 = arith.truncf %27 : vector<128x16xf32> to vector<128x16xbf16>
    %c3 = arith.constant 3 : index
    %c0_25 = arith.constant 0 : index
    %c0_26 = arith.constant 0 : index
    %29 = vector.load %arg4[%c3, %c0_25, %c0_26] : memref<9x16x32xbf16, #tpu.memory_space<vmem>>, vector<1x16x32xbf16>
    %30 = vector.shape_cast %29 : vector<1x16x32xbf16> to vector<16x32xbf16>
    %cst_27 = arith.constant dense<0.000000e+00> : vector<128x32xf32>
    %31 = tpu.matmul %28, %30, %cst_27 {dimension_numbers = #tpu.dot_dimension_numbers<[1], [0], [0], [1], [0, 0, 1, 1], [], []>} : vector<128x16xbf16>, vector<16x32xbf16>, vector<128x32xf32> -> vector<128x32xf32>
    %32 = arith.addf %25, %31 : vector<128x32xf32>
    %33 = vector.extract_strided_slice %3 {offsets = [0, 0, 0, 0], sizes = [2, 8, 8, 16], strides = [1, 1, 1, 1]} : vector<2x9x9x16xf32> to vector<2x8x8x16xf32>
    %34 = vector.shape_cast %33 : vector<2x8x8x16xf32> to vector<128x16xf32>
    %35 = arith.truncf %34 : vector<128x16xf32> to vector<128x16xbf16>
    %c4 = arith.constant 4 : index
    %c0_28 = arith.constant 0 : index
    %c0_29 = arith.constant 0 : index
    %36 = vector.load %arg4[%c4, %c0_28, %c0_29] : memref<9x16x32xbf16, #tpu.memory_space<vmem>>, vector<1x16x32xbf16>
    %37 = vector.shape_cast %36 : vector<1x16x32xbf16> to vector<16x32xbf16>
    %cst_30 = arith.constant dense<0.000000e+00> : vector<128x32xf32>
    %38 = tpu.matmul %35, %37, %cst_30 {dimension_numbers = #tpu.dot_dimension_numbers<[1], [0], [0], [1], [0, 0, 1, 1], [], []>} : vector<128x16xbf16>, vector<16x32xbf16>, vector<128x32xf32> -> vector<128x32xf32>
    %39 = arith.addf %32, %38 : vector<128x32xf32>
    %40 = vector.extract_strided_slice %2 {offsets = [0, 0, 1, 0], sizes = [2, 8, 8, 16], strides = [1, 1, 1, 1]} : vector<2x9x9x16xf32> to vector<2x8x8x16xf32>
    %41 = vector.shape_cast %40 : vector<2x8x8x16xf32> to vector<128x16xf32>
    %42 = arith.truncf %41 : vector<128x16xf32> to vector<128x16xbf16>
    %c5 = arith.constant 5 : index
    %c0_31 = arith.constant 0 : index
    %c0_32 = arith.constant 0 : index
    %43 = vector.load %arg4[%c5, %c0_31, %c0_32] : memref<9x16x32xbf16, #tpu.memory_space<vmem>>, vector<1x16x32xbf16>
    %44 = vector.shape_cast %43 : vector<1x16x32xbf16> to vector<16x32xbf16>
    %cst_33 = arith.constant dense<0.000000e+00> : vector<128x32xf32>
    %45 = tpu.matmul %42, %44, %cst_33 {dimension_numbers = #tpu.dot_dimension_numbers<[1], [0], [0], [1], [0, 0, 1, 1], [], []>} : vector<128x16xbf16>, vector<16x32xbf16>, vector<128x32xf32> -> vector<128x32xf32>
    %46 = arith.addf %39, %45 : vector<128x32xf32>
    %47 = vector.extract_strided_slice %0 {offsets = [0, 1, 0, 0], sizes = [2, 8, 8, 16], strides = [1, 1, 1, 1]} : vector<2x9x9x16xf32> to vector<2x8x8x16xf32>
    %48 = vector.shape_cast %47 : vector<2x8x8x16xf32> to vector<128x16xf32>
    %49 = arith.truncf %48 : vector<128x16xf32> to vector<128x16xbf16>
    %c6 = arith.constant 6 : index
    %c0_34 = arith.constant 0 : index
    %c0_35 = arith.constant 0 : index
    %50 = vector.load %arg4[%c6, %c0_34, %c0_35] : memref<9x16x32xbf16, #tpu.memory_space<vmem>>, vector<1x16x32xbf16>
    %51 = vector.shape_cast %50 : vector<1x16x32xbf16> to vector<16x32xbf16>
    %cst_36 = arith.constant dense<0.000000e+00> : vector<128x32xf32>
    %52 = tpu.matmul %49, %51, %cst_36 {dimension_numbers = #tpu.dot_dimension_numbers<[1], [0], [0], [1], [0, 0, 1, 1], [], []>} : vector<128x16xbf16>, vector<16x32xbf16>, vector<128x32xf32> -> vector<128x32xf32>
    %53 = arith.addf %46, %52 : vector<128x32xf32>
    %54 = vector.extract_strided_slice %1 {offsets = [0, 1, 0, 0], sizes = [2, 8, 8, 16], strides = [1, 1, 1, 1]} : vector<2x9x9x16xf32> to vector<2x8x8x16xf32>
    %55 = vector.shape_cast %54 : vector<2x8x8x16xf32> to vector<128x16xf32>
    %56 = arith.truncf %55 : vector<128x16xf32> to vector<128x16xbf16>
    %c7 = arith.constant 7 : index
    %c0_37 = arith.constant 0 : index
    %c0_38 = arith.constant 0 : index
    %57 = vector.load %arg4[%c7, %c0_37, %c0_38] : memref<9x16x32xbf16, #tpu.memory_space<vmem>>, vector<1x16x32xbf16>
    %58 = vector.shape_cast %57 : vector<1x16x32xbf16> to vector<16x32xbf16>
    %cst_39 = arith.constant dense<0.000000e+00> : vector<128x32xf32>
    %59 = tpu.matmul %56, %58, %cst_39 {dimension_numbers = #tpu.dot_dimension_numbers<[1], [0], [0], [1], [0, 0, 1, 1], [], []>} : vector<128x16xbf16>, vector<16x32xbf16>, vector<128x32xf32> -> vector<128x32xf32>
    %60 = arith.addf %53, %59 : vector<128x32xf32>
    %61 = vector.extract_strided_slice %0 {offsets = [0, 1, 1, 0], sizes = [2, 8, 8, 16], strides = [1, 1, 1, 1]} : vector<2x9x9x16xf32> to vector<2x8x8x16xf32>
    %62 = vector.shape_cast %61 : vector<2x8x8x16xf32> to vector<128x16xf32>
    %63 = arith.truncf %62 : vector<128x16xf32> to vector<128x16xbf16>
    %c8 = arith.constant 8 : index
    %c0_40 = arith.constant 0 : index
    %c0_41 = arith.constant 0 : index
    %64 = vector.load %arg4[%c8, %c0_40, %c0_41] : memref<9x16x32xbf16, #tpu.memory_space<vmem>>, vector<1x16x32xbf16>
    %65 = vector.shape_cast %64 : vector<1x16x32xbf16> to vector<16x32xbf16>
    %cst_42 = arith.constant dense<0.000000e+00> : vector<128x32xf32>
    %66 = tpu.matmul %63, %65, %cst_42 {dimension_numbers = #tpu.dot_dimension_numbers<[1], [0], [0], [1], [0, 0, 1, 1], [], []>} : vector<128x16xbf16>, vector<16x32xbf16>, vector<128x32xf32> -> vector<128x32xf32>
    %67 = arith.addf %60, %66 : vector<128x32xf32>
    %cst_43 = arith.constant dense<0.000000e+00> : vector<32xf32>
    %68 = vector.multi_reduction <add>, %67, %cst_43 [0] : vector<128x32xf32> to vector<32xf32>
    %69 = vector.shape_cast %68 : vector<32xf32> to vector<1x32xf32>
    %cst_44 = arith.constant 7.812500e-03 : f32
    %70 = vector.broadcast %cst_44 : f32 to vector<1x32xf32>
    %71 = arith.mulf %69, %70 : vector<1x32xf32>
    %72 = arith.mulf %67, %67 : vector<128x32xf32>
    %cst_45 = arith.constant dense<0.000000e+00> : vector<32xf32>
    %73 = vector.multi_reduction <add>, %72, %cst_45 [0] : vector<128x32xf32> to vector<32xf32>
    %74 = vector.shape_cast %73 : vector<32xf32> to vector<1x32xf32>
    %cst_46 = arith.constant 7.812500e-03 : f32
    %75 = vector.broadcast %cst_46 : f32 to vector<1x32xf32>
    %76 = arith.mulf %74, %75 : vector<1x32xf32>
    %77 = arith.mulf %71, %71 : vector<1x32xf32>
    %78 = arith.subf %76, %77 : vector<1x32xf32>
    %cst_47 = arith.constant 9.99999974E-6 : f32
    %79 = vector.broadcast %cst_47 : f32 to vector<1x32xf32>
    %80 = arith.addf %78, %79 : vector<1x32xf32>
    %81 = math.rsqrt %80 : vector<1x32xf32>
    %c0_48 = arith.constant 0 : index
    %c0_49 = arith.constant 0 : index
    %82 = vector.load %arg6[%c0_48, %c0_49] : memref<1x32xf32, #tpu.memory_space<vmem>>, vector<1x32xf32>
    %83 = arith.mulf %81, %82 : vector<1x32xf32>
    %cst_50 = arith.constant 0.000000e+00 : f32
    %84 = vector.broadcast %cst_50 : f32 to vector<1x32xf32>
    %85 = arith.subf %84, %71 : vector<1x32xf32>
    %86 = arith.mulf %85, %83 : vector<1x32xf32>
    %87 = vector.broadcast %83 : vector<1x32xf32> to vector<128x32xf32>
    %88 = arith.mulf %67, %87 : vector<128x32xf32>
    %89 = vector.broadcast %86 : vector<1x32xf32> to vector<128x32xf32>
    %90 = arith.addf %88, %89 : vector<128x32xf32>
    %cst_51 = arith.constant 0.000000e+00 : f32
    %91 = vector.broadcast %cst_51 : f32 to vector<128x32xf32>
    %92 = arith.maximumf %90, %91 : vector<128x32xf32>
    %cst_52 = arith.constant 0.000000e+00 : f32
    %93 = vector.broadcast %cst_52 : f32 to vector<2x10x10x32xf32>
    %c0_53 = arith.constant 0 : index
    %c0_54 = arith.constant 0 : index
    %c0_55 = arith.constant 0 : index
    %c0_56 = arith.constant 0 : index
    %94 = vector.load %arg12[%c0_53, %c0_54, %c0_55, %c0_56] : memref<2x10x10x32xf32, #tpu.memory_space<vmem>>, vector<2x10x10x32xf32>
    tpu.vector_store %arg12[%c0_53, %c0_54, %c0_55, %c0_56], %93 {strides = array<i32>} : memref<2x10x10x32xf32, #tpu.memory_space<vmem>>, vector<2x10x10x32xf32>,
    %95 = vector.shape_cast %92 : vector<128x32xf32> to vector<2x8x8x32xf32>
    %c0_57 = arith.constant 0 : index
    %c1_58 = arith.constant 1 : index
    %c1_59 = arith.constant 1 : index
    %c0_60 = arith.constant 0 : index
    %96 = vector.load %arg12[%c0_57, %c1_58, %c1_59, %c0_60] : memref<2x10x10x32xf32, #tpu.memory_space<vmem>>, vector<2x8x8x32xf32>
    tpu.vector_store %arg12[%c0_57, %c1_58, %c1_59, %c0_60], %95 {strides = array<i32>} : memref<2x10x10x32xf32, #tpu.memory_space<vmem>>, vector<2x8x8x32xf32>,
    %c0_61 = arith.constant 0 : index
    %c0_62 = arith.constant 0 : index
    %c0_63 = arith.constant 0 : index
    %c0_64 = arith.constant 0 : index
    %97 = vector.load %arg12[%c0_61, %c0_62, %c0_63, %c0_64] : memref<2x10x10x32xf32, #tpu.memory_space<vmem>>, vector<2x10x10x32xf32>
    %cst_65 = arith.constant 0.000000e+00 : f32
    %98 = vector.broadcast %cst_65 : f32 to vector<128x128xf32>
    %99 = vector.extract_strided_slice %97 {offsets = [0, 0, 0, 0], sizes = [2, 8, 8, 32], strides = [1, 1, 1, 1]} : vector<2x10x10x32xf32> to vector<2x8x8x32xf32>
    %100 = vector.shape_cast %99 : vector<2x8x8x32xf32> to vector<128x32xf32>
    %101 = arith.truncf %100 : vector<128x32xf32> to vector<128x32xbf16>
    %c0_66 = arith.constant 0 : index
    %c0_67 = arith.constant 0 : index
    %c0_68 = arith.constant 0 : index
    %102 = vector.load %arg5[%c0_66, %c0_67, %c0_68] : memref<9x32x128xbf16, #tpu.memory_space<vmem>>, vector<1x32x128xbf16>
    %103 = vector.shape_cast %102 : vector<1x32x128xbf16> to vector<32x128xbf16>
    %cst_69 = arith.constant dense<0.000000e+00> : vector<128x128xf32>
    %104 = tpu.matmul %101, %103, %cst_69 {dimension_numbers = #tpu.dot_dimension_numbers<[1], [0], [0], [1], [0, 0, 1, 1], [], []>} : vector<128x32xbf16>, vector<32x128xbf16>, vector<128x128xf32> -> vector<128x128xf32>
    %105 = arith.addf %98, %104 : vector<128x128xf32>
    %106 = vector.extract_strided_slice %97 {offsets = [0, 0, 1, 0], sizes = [2, 8, 8, 32], strides = [1, 1, 1, 1]} : vector<2x10x10x32xf32> to vector<2x8x8x32xf32>
    %107 = vector.shape_cast %106 : vector<2x8x8x32xf32> to vector<128x32xf32>
    %108 = arith.truncf %107 : vector<128x32xf32> to vector<128x32xbf16>
    %c1_70 = arith.constant 1 : index
    %c0_71 = arith.constant 0 : index
    %c0_72 = arith.constant 0 : index
    %109 = vector.load %arg5[%c1_70, %c0_71, %c0_72] : memref<9x32x128xbf16, #tpu.memory_space<vmem>>, vector<1x32x128xbf16>
    %110 = vector.shape_cast %109 : vector<1x32x128xbf16> to vector<32x128xbf16>
    %cst_73 = arith.constant dense<0.000000e+00> : vector<128x128xf32>
    %111 = tpu.matmul %108, %110, %cst_73 {dimension_numbers = #tpu.dot_dimension_numbers<[1], [0], [0], [1], [0, 0, 1, 1], [], []>} : vector<128x32xbf16>, vector<32x128xbf16>, vector<128x128xf32> -> vector<128x128xf32>
    %112 = arith.addf %105, %111 : vector<128x128xf32>
    %113 = vector.extract_strided_slice %97 {offsets = [0, 0, 2, 0], sizes = [2, 8, 8, 32], strides = [1, 1, 1, 1]} : vector<2x10x10x32xf32> to vector<2x8x8x32xf32>
    %114 = vector.shape_cast %113 : vector<2x8x8x32xf32> to vector<128x32xf32>
    %115 = arith.truncf %114 : vector<128x32xf32> to vector<128x32xbf16>
    %c2_74 = arith.constant 2 : index
    %c0_75 = arith.constant 0 : index
    %c0_76 = arith.constant 0 : index
    %116 = vector.load %arg5[%c2_74, %c0_75, %c0_76] : memref<9x32x128xbf16, #tpu.memory_space<vmem>>, vector<1x32x128xbf16>
    %117 = vector.shape_cast %116 : vector<1x32x128xbf16> to vector<32x128xbf16>
    %cst_77 = arith.constant dense<0.000000e+00> : vector<128x128xf32>
    %118 = tpu.matmul %115, %117, %cst_77 {dimension_numbers = #tpu.dot_dimension_numbers<[1], [0], [0], [1], [0, 0, 1, 1], [], []>} : vector<128x32xbf16>, vector<32x128xbf16>, vector<128x128xf32> -> vector<128x128xf32>
    %119 = arith.addf %112, %118 : vector<128x128xf32>
    %120 = vector.extract_strided_slice %97 {offsets = [0, 1, 0, 0], sizes = [2, 8, 8, 32], strides = [1, 1, 1, 1]} : vector<2x10x10x32xf32> to vector<2x8x8x32xf32>
    %121 = vector.shape_cast %120 : vector<2x8x8x32xf32> to vector<128x32xf32>
    %122 = arith.truncf %121 : vector<128x32xf32> to vector<128x32xbf16>
    %c3_78 = arith.constant 3 : index
    %c0_79 = arith.constant 0 : index
    %c0_80 = arith.constant 0 : index
    %123 = vector.load %arg5[%c3_78, %c0_79, %c0_80] : memref<9x32x128xbf16, #tpu.memory_space<vmem>>, vector<1x32x128xbf16>
    %124 = vector.shape_cast %123 : vector<1x32x128xbf16> to vector<32x128xbf16>
    %cst_81 = arith.constant dense<0.000000e+00> : vector<128x128xf32>
    %125 = tpu.matmul %122, %124, %cst_81 {dimension_numbers = #tpu.dot_dimension_numbers<[1], [0], [0], [1], [0, 0, 1, 1], [], []>} : vector<128x32xbf16>, vector<32x128xbf16>, vector<128x128xf32> -> vector<128x128xf32>
    %126 = arith.addf %119, %125 : vector<128x128xf32>
    %127 = vector.extract_strided_slice %97 {offsets = [0, 1, 1, 0], sizes = [2, 8, 8, 32], strides = [1, 1, 1, 1]} : vector<2x10x10x32xf32> to vector<2x8x8x32xf32>
    %128 = vector.shape_cast %127 : vector<2x8x8x32xf32> to vector<128x32xf32>
    %129 = arith.truncf %128 : vector<128x32xf32> to vector<128x32xbf16>
    %c4_82 = arith.constant 4 : index
    %c0_83 = arith.constant 0 : index
    %c0_84 = arith.constant 0 : index
    %130 = vector.load %arg5[%c4_82, %c0_83, %c0_84] : memref<9x32x128xbf16, #tpu.memory_space<vmem>>, vector<1x32x128xbf16>
    %131 = vector.shape_cast %130 : vector<1x32x128xbf16> to vector<32x128xbf16>
    %cst_85 = arith.constant dense<0.000000e+00> : vector<128x128xf32>
    %132 = tpu.matmul %129, %131, %cst_85 {dimension_numbers = #tpu.dot_dimension_numbers<[1], [0], [0], [1], [0, 0, 1, 1], [], []>} : vector<128x32xbf16>, vector<32x128xbf16>, vector<128x128xf32> -> vector<128x128xf32>
    %133 = arith.addf %126, %132 : vector<128x128xf32>
    %134 = vector.extract_strided_slice %97 {offsets = [0, 1, 2, 0], sizes = [2, 8, 8, 32], strides = [1, 1, 1, 1]} : vector<2x10x10x32xf32> to vector<2x8x8x32xf32>
    %135 = vector.shape_cast %134 : vector<2x8x8x32xf32> to vector<128x32xf32>
    %136 = arith.truncf %135 : vector<128x32xf32> to vector<128x32xbf16>
    %c5_86 = arith.constant 5 : index
    %c0_87 = arith.constant 0 : index
    %c0_88 = arith.constant 0 : index
    %137 = vector.load %arg5[%c5_86, %c0_87, %c0_88] : memref<9x32x128xbf16, #tpu.memory_space<vmem>>, vector<1x32x128xbf16>
    %138 = vector.shape_cast %137 : vector<1x32x128xbf16> to vector<32x128xbf16>
    %cst_89 = arith.constant dense<0.000000e+00> : vector<128x128xf32>
    %139 = tpu.matmul %136, %138, %cst_89 {dimension_numbers = #tpu.dot_dimension_numbers<[1], [0], [0], [1], [0, 0, 1, 1], [], []>} : vector<128x32xbf16>, vector<32x128xbf16>, vector<128x128xf32> -> vector<128x128xf32>
    %140 = arith.addf %133, %139 : vector<128x128xf32>
    %141 = vector.extract_strided_slice %97 {offsets = [0, 2, 0, 0], sizes = [2, 8, 8, 32], strides = [1, 1, 1, 1]} : vector<2x10x10x32xf32> to vector<2x8x8x32xf32>
    %142 = vector.shape_cast %141 : vector<2x8x8x32xf32> to vector<128x32xf32>
    %143 = arith.truncf %142 : vector<128x32xf32> to vector<128x32xbf16>
    %c6_90 = arith.constant 6 : index
    %c0_91 = arith.constant 0 : index
    %c0_92 = arith.constant 0 : index
    %144 = vector.load %arg5[%c6_90, %c0_91, %c0_92] : memref<9x32x128xbf16, #tpu.memory_space<vmem>>, vector<1x32x128xbf16>
    %145 = vector.shape_cast %144 : vector<1x32x128xbf16> to vector<32x128xbf16>
    %cst_93 = arith.constant dense<0.000000e+00> : vector<128x128xf32>
    %146 = tpu.matmul %143, %145, %cst_93 {dimension_numbers = #tpu.dot_dimension_numbers<[1], [0], [0], [1], [0, 0, 1, 1], [], []>} : vector<128x32xbf16>, vector<32x128xbf16>, vector<128x128xf32> -> vector<128x128xf32>
    %147 = arith.addf %140, %146 : vector<128x128xf32>
    %148 = vector.extract_strided_slice %97 {offsets = [0, 2, 1, 0], sizes = [2, 8, 8, 32], strides = [1, 1, 1, 1]} : vector<2x10x10x32xf32> to vector<2x8x8x32xf32>
    %149 = vector.shape_cast %148 : vector<2x8x8x32xf32> to vector<128x32xf32>
    %150 = arith.truncf %149 : vector<128x32xf32> to vector<128x32xbf16>
    %c7_94 = arith.constant 7 : index
    %c0_95 = arith.constant 0 : index
    %c0_96 = arith.constant 0 : index
    %151 = vector.load %arg5[%c7_94, %c0_95, %c0_96] : memref<9x32x128xbf16, #tpu.memory_space<vmem>>, vector<1x32x128xbf16>
    %152 = vector.shape_cast %151 : vector<1x32x128xbf16> to vector<32x128xbf16>
    %cst_97 = arith.constant dense<0.000000e+00> : vector<128x128xf32>
    %153 = tpu.matmul %150, %152, %cst_97 {dimension_numbers = #tpu.dot_dimension_numbers<[1], [0], [0], [1], [0, 0, 1, 1], [], []>} : vector<128x32xbf16>, vector<32x128xbf16>, vector<128x128xf32> -> vector<128x128xf32>
    %154 = arith.addf %147, %153 : vector<128x128xf32>
    %155 = vector.extract_strided_slice %97 {offsets = [0, 2, 2, 0], sizes = [2, 8, 8, 32], strides = [1, 1, 1, 1]} : vector<2x10x10x32xf32> to vector<2x8x8x32xf32>
    %156 = vector.shape_cast %155 : vector<2x8x8x32xf32> to vector<128x32xf32>
    %157 = arith.truncf %156 : vector<128x32xf32> to vector<128x32xbf16>
    %c8_98 = arith.constant 8 : index
    %c0_99 = arith.constant 0 : index
    %c0_100 = arith.constant 0 : index
    %158 = vector.load %arg5[%c8_98, %c0_99, %c0_100] : memref<9x32x128xbf16, #tpu.memory_space<vmem>>, vector<1x32x128xbf16>
    %159 = vector.shape_cast %158 : vector<1x32x128xbf16> to vector<32x128xbf16>
    %cst_101 = arith.constant dense<0.000000e+00> : vector<128x128xf32>
    %160 = tpu.matmul %157, %159, %cst_101 {dimension_numbers = #tpu.dot_dimension_numbers<[1], [0], [0], [1], [0, 0, 1, 1], [], []>} : vector<128x32xbf16>, vector<32x128xbf16>, vector<128x128xf32> -> vector<128x128xf32>
    %161 = arith.addf %154, %160 : vector<128x128xf32>
    %cst_102 = arith.constant dense<0.000000e+00> : vector<128xf32>
    %162 = vector.multi_reduction <add>, %161, %cst_102 [0] : vector<128x128xf32> to vector<128xf32>
    %163 = vector.shape_cast %162 : vector<128xf32> to vector<1x128xf32>
    %cst_103 = arith.constant 7.812500e-03 : f32
    %164 = vector.broadcast %cst_103 : f32 to vector<1x128xf32>
    %165 = arith.mulf %163, %164 : vector<1x128xf32>
    %166 = arith.mulf %161, %161 : vector<128x128xf32>
    %cst_104 = arith.constant dense<0.000000e+00> : vector<128xf32>
    %167 = vector.multi_reduction <add>, %166, %cst_104 [0] : vector<128x128xf32> to vector<128xf32>
    %168 = vector.shape_cast %167 : vector<128xf32> to vector<1x128xf32>
    %cst_105 = arith.constant 7.812500e-03 : f32
    %169 = vector.broadcast %cst_105 : f32 to vector<1x128xf32>
    %170 = arith.mulf %168, %169 : vector<1x128xf32>
    %171 = arith.mulf %165, %165 : vector<1x128xf32>
    %172 = arith.subf %170, %171 : vector<1x128xf32>
    %cst_106 = arith.constant 9.99999974E-6 : f32
    %173 = vector.broadcast %cst_106 : f32 to vector<1x128xf32>
    %174 = arith.addf %172, %173 : vector<1x128xf32>
    %175 = math.rsqrt %174 : vector<1x128xf32>
    %c0_107 = arith.constant 0 : index
    %c0_108 = arith.constant 0 : index
    %176 = vector.load %arg7[%c0_107, %c0_108] : memref<1x128xf32, #tpu.memory_space<vmem>>, vector<1x128xf32>
    %177 = arith.mulf %175, %176 : vector<1x128xf32>
    %cst_109 = arith.constant 0.000000e+00 : f32
    %178 = vector.broadcast %cst_109 : f32 to vector<1x128xf32>
    %179 = arith.subf %178, %165 : vector<1x128xf32>
    %180 = arith.mulf %179, %177 : vector<1x128xf32>
    %181 = vector.broadcast %177 : vector<1x128xf32> to vector<128x128xf32>
    %182 = arith.mulf %161, %181 : vector<128x128xf32>
    %183 = vector.broadcast %180 : vector<1x128xf32> to vector<128x128xf32>
    %184 = arith.addf %182, %183 : vector<128x128xf32>
    %185 = vector.extract_strided_slice %3 {offsets = [0, 0, 0, 0], sizes = [2, 8, 8, 16], strides = [1, 1, 1, 1]} : vector<2x9x9x16xf32> to vector<2x8x8x16xf32>
    %186 = vector.shape_cast %185 : vector<2x8x8x16xf32> to vector<128x16xf32>
    %187 = arith.truncf %186 : vector<128x16xf32> to vector<128x16xbf16>
    %c0_110 = arith.constant 0 : index
    %c0_111 = arith.constant 0 : index
    %188 = vector.load %arg8[%c0_110, %c0_111] : memref<16x128xbf16, #tpu.memory_space<vmem>>, vector<16x128xbf16>
    %cst_112 = arith.constant dense<0.000000e+00> : vector<128x128xf32>
    %189 = tpu.matmul %187, %188, %cst_112 {dimension_numbers = #tpu.dot_dimension_numbers<[1], [0], [0], [1], [0, 0, 1, 1], [], []>} : vector<128x16xbf16>, vector<16x128xbf16>, vector<128x128xf32> -> vector<128x128xf32>
    %cst_113 = arith.constant dense<0.000000e+00> : vector<128xf32>
    %190 = vector.multi_reduction <add>, %189, %cst_113 [0] : vector<128x128xf32> to vector<128xf32>
    %191 = vector.shape_cast %190 : vector<128xf32> to vector<1x128xf32>
    %cst_114 = arith.constant 7.812500e-03 : f32
    %192 = vector.broadcast %cst_114 : f32 to vector<1x128xf32>
    %193 = arith.mulf %191, %192 : vector<1x128xf32>
    %194 = arith.mulf %189, %189 : vector<128x128xf32>
    %cst_115 = arith.constant dense<0.000000e+00> : vector<128xf32>
    %195 = vector.multi_reduction <add>, %194, %cst_115 [0] : vector<128x128xf32> to vector<128xf32>
    %196 = vector.shape_cast %195 : vector<128xf32> to vector<1x128xf32>
    %cst_116 = arith.constant 7.812500e-03 : f32
    %197 = vector.broadcast %cst_116 : f32 to vector<1x128xf32>
    %198 = arith.mulf %196, %197 : vector<1x128xf32>
    %199 = arith.mulf %193, %193 : vector<1x128xf32>
    %200 = arith.subf %198, %199 : vector<1x128xf32>
    %cst_117 = arith.constant 9.99999974E-6 : f32
    %201 = vector.broadcast %cst_117 : f32 to vector<1x128xf32>
    %202 = arith.addf %200, %201 : vector<1x128xf32>
    %203 = math.rsqrt %202 : vector<1x128xf32>
    %c0_118 = arith.constant 0 : index
    %c0_119 = arith.constant 0 : index
    %204 = vector.load %arg9[%c0_118, %c0_119] : memref<1x128xf32, #tpu.memory_space<vmem>>, vector<1x128xf32>
    %205 = arith.mulf %203, %204 : vector<1x128xf32>
    %cst_120 = arith.constant 0.000000e+00 : f32
    %206 = vector.broadcast %cst_120 : f32 to vector<1x128xf32>
    %207 = arith.subf %206, %193 : vector<1x128xf32>
    %208 = arith.mulf %207, %205 : vector<1x128xf32>
    %c0_121 = arith.constant 0 : index
    %c0_122 = arith.constant 0 : index
    %209 = vector.load %arg10[%c0_121, %c0_122] : memref<1x128xf32, #tpu.memory_space<vmem>>, vector<1x128xf32>
    %210 = arith.addf %208, %209 : vector<1x128xf32>
    %211 = vector.broadcast %205 : vector<1x128xf32> to vector<128x128xf32>
    %212 = arith.mulf %189, %211 : vector<128x128xf32>
    %213 = vector.broadcast %210 : vector<1x128xf32> to vector<128x128xf32>
    %214 = arith.addf %212, %213 : vector<128x128xf32>
    %215 = arith.addf %184, %214 : vector<128x128xf32>
    %cst_123 = arith.constant 0.000000e+00 : f32
    %216 = vector.broadcast %cst_123 : f32 to vector<128x128xf32>
    %217 = arith.maximumf %215, %216 : vector<128x128xf32>
    %c0_124 = arith.constant 0 : index
    %c0_125 = arith.constant 0 : index
    %218 = vector.load %arg11[%c0_124, %c0_125] : memref<128x128xf32, #tpu.memory_space<vmem>>, vector<128x128xf32>
    tpu.vector_store %arg11[%c0_124, %c0_125], %217 {strides = array<i32>} : memref<128x128xf32, #tpu.memory_space<vmem>>, vector<128x128xf32>,
    return
  }
}

</mosaic_0001>

<bundles_post_ra>
// kernel: tpu_custom_call.1
= control target key start
LH: loop header
LB: loop body
LE: loop exit
PB: predicated region body
PF: predicated region fallthrough
CT: control target
= control target key end

     0   :  { %vm169_vm0 = vcmask 130048   ;;  %vm450_vm1 = vcmask 1046528   ;;  %s6869_s0 = inlined_call_operand.vmem [shape: f32[2,9,9,16], index: 0, kind: input, shape index: {}]   ;;  %s6870_s1 = inlined_call_operand.vmem [shape: f32[2,9,9,16], index: 1, kind: input, shape index: {}]   ;;  %s6871_s2 = inlined_call_operand.vmem [shape: f32[2,9,9,16], index: 2, kind: input, shape index: {}]   ;;  %s6872_s3 = inlined_call_operand.vmem [shape: f32[2,9,9,16], index: 3, kind: input, shape index: {}]   ;;  %s6873_s4 = inlined_call_operand.vmem [shape: bf16[9,16,32], index: 4, kind: input, shape index: {}]   ;;  %s6874_s5 = inlined_call_operand.vmem [shape: bf16[9,32,128], index: 5, kind: input, shape index: {}]   ;;  %s6875_s6 = inlined_call_operand.vmem [shape: f32[1,32], index: 6, kind: input, shape index: {}]   ;;  %s6876_s7 = inlined_call_operand.vmem [shape: f32[1,128], index: 7, kind: input, shape index: {}]   ;;  %s6877_s8 = inlined_call_operand.vmem [shape: bf16[16,128], index: 8, kind: input, shape index: {}]   ;;  %s6878_s9 = inlined_call_operand.vmem [shape: f32[1,128], index: 9, kind: input, shape index: {}]   ;;  %s6879_s10 = inlined_call_operand.vmem [shape: f32[1,128], index: 10, kind: input, shape index: {}]   ;;  %s6880_s11 = inlined_call_operand.hbm [shape: f32[128,128], index: 11, kind: output, shape index: {}]  }
   0x1   :  { %v4927_v0 = vld [vmem:[%s6873_s4 + $0x8] sm:$0xff]   ;;  %v76_v1 = vld [vmem:[%s6870_s1] sm:$0xff]  ;;  %v5058_v2 = vld [vmem:[%s6870_s1 + $0x10] sm:$0xff] }
   0x2   :  { %v5063_v3 = vld [vmem:[%s6870_s1 + $0x20] sm:$0xff]  ;;  %4305 = vmatprep.subr.bf16.mxu0 %v4927_v0  ;;  %v5068_v4 = vld [vmem:[%s6870_s1 + $0x30] sm:$0xff]  ;;  %v152_v6 = vpack.c.bf16 %v5058_v2, %v76_v1  ;;  %4665 = vmatprep.subr.bf16.mxu1 %v4927_v0  ;;  %v47_v24 = vld [vmem:[%s6869_s0 + $0x38] sm:$0x1] }
   0x3   :  { %v5073_v5 = vld [vmem:[%s6870_s1 + $0x40] sm:$0xff]  ;;  %4306 = vmatpush3.bf16.msra.mxu0 %v4927_v0  ;;  %v153_v8 = vpack.c.bf16 %v5068_v4, %v5063_v3  ;;  %v5088_v11 = vld [vmem:[%s6870_s1 + $0x50] sm:$0xff]  ;;  %4666 = vmatpush3.bf16.msra.mxu1 %v4927_v0  ;;  %v461_v26 = vrot.slane %v47_v24, 1  ;;  %v49_v28 = vld [vmem:[%s6869_s0 + $0x48] sm:$0x1] }
   0x4   :  { %v4928_v10 = vld [vmem:[%s6873_s4] sm:$0xff]   ;;  %4307 = vmatprep.mubr.msk.bf16.mxu0 %vm169_vm0, %v152_v6  ;;  %v154_v12 = vpack.c.bf16 %v5088_v11, %v5073_v5  ;;  %v5102_v14 = vld [vmem:[%s6870_s1 + $0x70] sm:$0xff]  ;;  %v464_v30 = vrot.slane %v49_v28, 1  ;;  %v4930_v36 = vld [vmem:[%s6873_s4 + $0x18] sm:$0xff]  }
   0x5   :  { %4323 = vmatprep.subr.bf16.mxu0 %v4928_v10  ;;  %v5096_v13 = vld [vmem:[%s6870_s1 + $0x60] sm:$0xff]  ;;  %v5108_v15 = vld [vmem:[%s6869_s0 + $0x30] sm:$0xff]  ;;  %v41_v47 = vld [vmem:[%s6869_s0 + $0x8] sm:$0x1] }
   0x6   :  { %4308 = vmatmul.mubr.msk.bf16.vlgmr.msra.gmra.mrb[0].mxu0 %vm169_vm0, %v153_v8  ;;  %v4929_v16 = vld [vmem:[%s6873_s4 + $0x10] sm:$0xff]   ;;  %v5116_v17 = vld [vmem:[%s6869_s0 + $0x40] sm:$0xff]  ;;  %v155_v21 = vpack.c.bf16 %v5102_v14, %v5096_v13  ;;  %v460_v23 = vrot.slane %v5108_v15, 1  ;;  %v43_v48 = vld [vmem:[%s6869_s0 + $0x18] sm:$0x1]  ;;  %v452_v53 = vrot.slane %v41_v47, 1 }
   0x7   :  { %4324 = vmatpush3.bf16.msra.mxu0 %v4928_v10  ;;  %4311 = vmatprep.mubr.msk.bf16.mxu0 %vm169_vm0, %v154_v12  ;;  %v40_v18 = vld [vmem:[%s6869_s0] sm:$0xff]  ;;  %v5124_v19 = vld [vmem:[%s6869_s0 + $0x10] sm:$0xff]  ;;  %v463_v25 = vrot.slane %v5116_v17, 1  ;;  %v455_v54 = vrot.slane %v43_v48, 1  ;;  %v45_v58 = vld [vmem:[%s6869_s0 + $0x28] sm:$0x1] }
   0x8   :  { %4341 = vmatprep.subr.bf16.mxu0 %v4929_v16  ;;  %v142_v22 = vpack.c.bf16 %v5124_v19, %v40_v18  ;;  %v5141_v27 = vld [vmem:[%s6869_s0 + $0x20] sm:$0xff]  ;;  %v5149_v29 = vld [vmem:[%s6869_s0 + $0x50] sm:$0xff]  ;;  %v5154_v32 = vsel %vm450_vm1, %v460_v23, %v461_v26  ;;  %v451_v51 = vrot.slane %v40_v18, 1  ;;  %v454_v52 = vrot.slane %v5124_v19, 1  ;;  %v51_v59 = vld [vmem:[%s6869_s0 + $0x58] sm:$0x1] }
   0x9   :  { %v143_v31 = vpack.c.bf16 %v5108_v15, %v5141_v27  ;;  %6907 = vst [vmem:[#allocation6_spill] sm:$0xff] %v5154_v32  ;;  %v5157_v33 = vsel %vm450_vm1, %v463_v25, %v464_v30  ;;  %v144_v34 = vpack.c.bf16 %v5149_v29, %v5116_v17  ;;  %v5171_v37 = vld [vmem:[%s6869_s0 + $0x60] sm:$0xff]  ;;  %v5176_v38 = vld [vmem:[%s6869_s0 + $0x70] sm:$0xff]  ;;  %v457_v55 = vrot.slane %v5141_v27, 1  ;;  %v53_v60 = vld [vmem:[%s6869_s0 + $0x68] sm:$0x1] }
   0xa   :  { %6908 = vst [vmem:[#allocation7_spill] sm:$0xff] %v5157_v33  ;;  %v5181_v39 = vld [vmem:[%s6869_s0 + $0x90] sm:$0xff]  ;;  %v5186_v40 = vld [vmem:[%s6869_s0 + $0xa0] sm:$0xff]  ;;  %v145_v41 = vpack.c.bf16 %v5176_v38, %v5171_v37  ;;  %v55_v61 = vld [vmem:[%s6869_s0 + $0x78] sm:$0x1]  ;;  %v466_v62 = vrot.slane %v5149_v29, 1  ;;  %v453_v0 = vsel %vm450_vm1, %v451_v51, %v452_v53  ;;  %v5254_v1 = vsel %vm450_vm1, %v454_v52, %v455_v54 }
   0xb   :  { %v146_v42 = vpack.c.bf16 %v5186_v40, %v5181_v39  ;;  %v5197_v43 = vld [vmem:[%s6869_s0 + $0xb0] sm:$0xff]  ;;  %v5202_v44 = vld [vmem:[%s6869_s0 + $0xc0] sm:$0xff]  ;;  %v469_v63 = vrot.slane %v5171_v37, 1  ;;  %v59_v6 = vld [vmem:[%s6869_s0 + $0x98] sm:$0x1]  ;;  %v472_v10 = vrot.slane %v5176_v38, 1  ;;  %v515_v25 = vpack.c.bf16 %v5254_v1, %v453_v0 }
   0xc   :  { %v5207_v45 = vld [vmem:[%s6869_s0 + $0xd0] sm:$0xff]  ;;  %v5212_v46 = vld [vmem:[%s6869_s0 + $0xe0] sm:$0xff]  ;;  %v147_v49 = vpack.c.bf16 %v5202_v44, %v5197_v43  ;;  %v61_v8 = vld [vmem:[%s6869_s0 + $0xa8] sm:$0x1]  ;;  %v475_v12 = vrot.slane %v5181_v39, 1  ;;  %v470_v23 = vrot.slane %v53_v60, 1 }
   0xd   :  { %v148_v50 = vpack.c.bf16 %v5212_v46, %v5207_v45  ;;  %v5230_v56 = vld [vmem:[%s6869_s0 + $0xf0] sm:$0xff]  ;;  %v5235_v57 = vld [vmem:[%s6869_s0 + $0x100] sm:$0xff]  ;;  %v473_v24 = vrot.slane %v55_v61, 1  ;;  %v476_v26 = vrot.slane %v59_v6, 1  ;;  %v479_v28 = vrot.slane %v61_v8, 1 }
   0xe   :  { %4312 = vmatmul.mubr.msk.bf16.gmra.mrb[4].mxu0 %vm169_vm0, %v155_v21  ;;  %v149_v18 = vpack.c.bf16 %v5235_v57, %v5230_v56  ;;  %v458_v21 = vrot.slane %v45_v58, 1  ;;  %v63_v47 = vld [vmem:[%s6869_s0 + $0xb8] sm:$0x1]  ;;  %v65_v48 = vld [vmem:[%s6869_s0 + $0xc8] sm:$0x1] }
   0xf   :  { %4325 = vmatprep.mubr.msk.bf16.mxu0 %vm169_vm0, %v142_v22  ;;  %v467_v22 = vrot.slane %v51_v59, 1  ;;  %v67_v51 = vld [vmem:[%s6869_s0 + $0xd8] sm:$0x1]  ;;  %v477_v53 = vsel %vm450_vm1, %v475_v12, %v476_v26 }
  0x16   :  { %4326 = vmatmul.mubr.msk.bf16.vlgmr.msra.gmra.mrb[0].mxu0 %vm169_vm0, %v143_v31  ;;  %v5273_v31 = vsel %vm450_vm1, %v457_v55, %v458_v21 }
  0x17   :  { %4342 = vmatpush3.bf16.msra.mxu0 %v4929_v16  ;;  %4329 = vmatprep.mubr.msk.bf16.mxu0 %vm169_vm0, %v144_v34  ;;  %v478_v16 = vrot.slane %v5186_v40, 1  ;;  %v5276_v34 = vsel %vm450_vm1, %v466_v62, %v467_v22  ;;  %v516_v39 = vpack.c.bf16 %v5154_v32, %v5273_v31 }
  0x18   :  { %4359 = vmatprep.subr.bf16.mxu0 %v4930_v36  ;;  %6909 = vst [vmem:[#allocation8_spill] sm:$0xff] %v5276_v34 }
  0x19   :  { %v5306_v54 = vsel %vm450_vm1, %v478_v16, %v479_v28 }
  0x1a   :  { %6912 = vst [vmem:[#allocation11_spill] sm:$0xff] %v5306_v54 }
  0x1e   :  { %4330 = vmatmul.mubr.msk.bf16.gmra.mrb[4].mxu0 %vm169_vm0, %v145_v41  ;;  %v4931_v41 = vld [vmem:[%s6873_s4 + $0x20] sm:$0xff]  }
  0x1f   :  { %4333 = vmatprep.mubr.msk.bf16.mxu0 %vm169_vm0, %v146_v42  ;;  %v517_v42 = vpack.c.bf16 %v5276_v34, %v5157_v33 }
  0x26   :  { %4334 = vmatmul.mubr.msk.bf16.gmra.mrb[8].mxu0 %vm169_vm0, %v147_v49  ;;  %v5294_v49 = vsel %vm450_vm1, %v469_v63, %v470_v23 }
  0x27   :  { %4337 = vmatprep.mubr.msk.bf16.mxu0 %vm169_vm0, %v148_v50  ;;  %6910 = vst [vmem:[#allocation9_spill] sm:$0xff] %v5294_v49  ;;  %v5297_v50 = vsel %vm450_vm1, %v472_v10, %v473_v24 }
  0x28   :  { %6911 = vst [vmem:[#allocation10_spill] sm:$0xff] %v5297_v50 }
  0x2e   :  { %4338 = vmatmul.mubr.msk.bf16.gmra.mrb[12].mxu0 %vm169_vm0, %v149_v18 }
  0x2f   :  { %4343 = vmatprep.mubr.msk.bf16.mxu0 %vm169_vm0, %v515_v25 }
  0x36   :  { %4344 = vmatmul.mubr.msk.bf16.vlgmr.msra.gmra.mrb[0].mxu0 %vm169_vm0, %v516_v39 }
  0x37   :  { %4360 = vmatpush3.bf16.msra.mxu0 %v4930_v36  ;;  %4347 = vmatprep.mubr.msk.bf16.mxu0 %vm169_vm0, %v517_v42  ;;  %v69_v36 = vld [vmem:[%s6869_s0 + $0xe8] sm:$0x1] }
  0x38   :  { %4377 = vmatprep.subr.bf16.mxu0 %v4931_v41 }
  0x39   :  { %16 = vsyncpa [#allocation4], 0  ;;  %v481_v55 = vrot.slane %v5197_v43, 1  ;;  %v518_v58 = vpack.c.bf16 %v5297_v50, %v5294_v49  ;;  %v484_v59 = vrot.slane %v5202_v44, 1  ;;  %v519_v60 = vpack.c.bf16 %v5306_v54, %v477_v53  ;;  %v71_v23 = vld [vmem:[%s6869_s0 + $0xf8] sm:$0x1] }
  0x3a   :  { %v482_v61 = vrot.slane %v63_v47, 1  ;;  %v485_v62 = vrot.slane %v65_v48, 1  ;;  %v487_v63 = vrot.slane %v5207_v45, 1  ;;  %v490_v0 = vrot.slane %v5212_v46, 1  ;;  %v73_v24 = vld [vmem:[%s6869_s0 + $0x108] sm:$0x1] }
  0x3b   :  { %v488_v6 = vrot.slane %v67_v51, 1  ;;  %v491_v8 = vrot.slane %v69_v36, 1  ;;  %v493_v25 = vrot.slane %v5230_v56, 1  ;;  %v496_v28 = vrot.slane %v5235_v57, 1  ;;  %v5361_v36 = vld [vmem:[%s6871_s2] sm:$0xff]  ;;  %v5486_v48 = vld [vmem:[%s6870_s1 + $0xf0] sm:$0xff] }
  0x3c   :  { %v5323_v12 = vsel %vm450_vm1, %v481_v55, %v482_v61  ;;  %v5326_v16 = vsel %vm450_vm1, %v484_v59, %v485_v62  ;;  %v494_v42 = vrot.slane %v71_v23, 1  ;;  %v497_v47 = vrot.slane %v73_v24, 1  ;;  %v5366_v55 = vld [vmem:[%s6871_s2 + $0x10] sm:$0xff]  ;;  %v5387_v62 = vld [vmem:[%s6871_s2 + $0x40] sm:$0xff] }
  0x3d   :  { %6913 = vst [vmem:[#allocation12_spill] sm:$0xff] %v5323_v12  ;;  %6914 = vst [vmem:[#allocation13_spill] sm:$0xff] %v5326_v16  ;;  %v5331_v21 = vsel %vm450_vm1, %v487_v63, %v488_v6  ;;  %v5334_v22 = vsel %vm450_vm1, %v490_v0, %v491_v8  ;;  %v520_v26 = vpack.c.bf16 %v5326_v16, %v5323_v12  ;;  %v5382_v61 = vld [vmem:[%s6871_s2 + $0x30] sm:$0xff]  ;;  %v4932_v8 = vld [vmem:[%s6873_s4 + $0x28] sm:$0xff]   ;;  %v1009_v16 = vrot.slane %v5361_v36, 1 }
  0x3e   :  { %4348 = vmatmul.mubr.msk.bf16.gmra.mrb[4].mxu0 %vm169_vm0, %v518_v58  ;;  %6915 = vst [vmem:[#allocation14_spill] sm:$0xff] %v5331_v21  ;;  %6916 = vst [vmem:[#allocation15_spill] sm:$0xff] %v5334_v22  ;;  %v521_v39 = vpack.c.bf16 %v5334_v22, %v5331_v21  ;;  %v5353_v51 = vsel %vm450_vm1, %v493_v25, %v494_v42  ;;  %v5356_v53 = vsel %vm450_vm1, %v496_v28, %v497_v47  ;;  %v5392_v63 = vld [vmem:[%s6871_s2 + $0x50] sm:$0xff]  ;;  %v5406_v23 = vld [vmem:[%s6871_s2 + $0x60] sm:$0xff]  ;;  %vm1701_vm2 = vcmask 261120  }
  0x3f   :  { %4351 = vmatprep.mubr.msk.bf16.mxu0 %vm169_vm0, %v519_v60  ;;  %6917 = vst [vmem:[#allocation16_spill] sm:$0xff] %v5353_v51  ;;  %6918 = vst [vmem:[#allocation17_spill] sm:$0xff] %v5356_v53  ;;  %v522_v58 = vpack.c.bf16 %v5356_v53, %v5353_v51  ;;  %v669_v59 = vpack.c.bf16 %v5366_v55, %v5361_v36  ;;  %v5377_v60 = vld [vmem:[%s6871_s2 + $0x20] sm:$0xff]  ;;  %v671_v6 = vpack.c.bf16 %v5392_v63, %v5387_v62  ;;  %v5411_v24 = vld [vmem:[%s6871_s2 + $0x70] sm:$0xff]  ;;  %vm1859_vm3 = vcmask 254976  }
  0x40   :  { %v670_v0 = vpack.c.bf16 %v5382_v61, %v5377_v60  ;;  %v5416_v25 = vld [vmem:[%s6871_s2 + $0x90] sm:$0xff]  ;;  %v5436_v42 = vld [vmem:[%s6870_s1 + $0xa0] sm:$0xff]  ;;  %v97_v22 = vld [vmem:[%s6871_s2 + $0x18] sm:$0x1]  ;;  %v1012_v12 = vrot.slane %v5366_v55, 1  ;;  %v1024_v33 = vrot.slane %v5392_v63, 1 }
  0x41   :  { %v5441_v47 = vld [vmem:[%s6870_s1 + $0xb0] sm:$0xff]  ;;  %v5481_v7 = vld [vmem:[%s6870_s1 + $0xe0] sm:$0xff]  ;;  %v1013_v50 = vrot.slane %v97_v22, 1  ;;  %v109_v63 = vld [vmem:[%s6871_s2 + $0x78] sm:$0x1]  ;;  %vm2343_vm4 = vcmask 1045504  }
  0x42   :  { %v5492_v35 = vld [vmem:[%s6871_s2 + $0xf0] sm:$0xff]  ;;  %v126_v10 = vld [vmem:[%s6872_s3] sm:$0xff] }
  0x43   :  { %v128_v18 = vld [vmem:[%s6872_s3 + $0x20] sm:$0xff]  ;;  %v129_v30 = vld [vmem:[%s6872_s3 + $0x30] sm:$0xff] }
  0x44   :  { %v130_v53 = vld [vmem:[%s6872_s3 + $0x40] sm:$0xff]  ;;  %v140_v22 = vld [vmem:[%s6872_s3 + $0xf0] sm:$0xff] }
  0x45   :  { %v132_v51 = vld [vmem:[%s6872_s3 + $0x60] sm:$0xff] }
  0x46   :  { %4352 = vmatmul.mubr.msk.bf16.gmra.mrb[8].mxu0 %vm169_vm0, %v520_v26  ;;  %v672_v26 = vpack.c.bf16 %v5411_v24, %v5406_v23  ;;  %v5595_v32 = vld [vmem:[%s6870_s1 + $0x100] sm:$0xff] }
  0x47   :  { %4355 = vmatprep.mubr.msk.bf16.mxu0 %vm169_vm0, %v521_v39  ;;  %v5431_v39 = vld [vmem:[%s6871_s2 + $0xb0] sm:$0xff]  ;;  %v141_v36 = vld [vmem:[%s6872_s3 + $0x100] sm:$0xff] }
  0x4e   :  { %4356 = vmatmul.mubr.msk.bf16.gmra.mrb[12].mxu0 %vm169_vm0, %v522_v58  ;;  %v5447_v58 = vld [vmem:[%s6871_s2 + $0xc0] sm:$0xff] }
  0x4f   :  { %4361 = vmatprep.mubr.msk.bf16.mxu0 %vm169_vm0, %v669_v59  ;;  %v674_v59 = vpack.c.bf16 %v5447_v58, %v5431_v39 }
  0x56   :  { %4362 = vmatmul.mubr.msk.bf16.vlgmr.msra.gmra.mrb[0].mxu0 %vm169_vm0, %v670_v0  ;;  %v5454_v0 = vld [vmem:[%s6870_s1 + $0xc0] sm:$0xff] }
  0x57   :  { %4378 = vmatpush3.bf16.msra.mxu0 %v4931_v41  ;;  %4365 = vmatprep.mubr.msk.bf16.mxu0 %vm169_vm0, %v671_v6  ;;  %v5421_v41 = vld [vmem:[%s6871_s2 + $0xa0] sm:$0xff]  ;;  %v5459_v6 = vld [vmem:[%s6870_s1 + $0xd0] sm:$0xff] }
  0x58   :  { %4395 = vmatprep.subr.bf16.mxu0 %v4932_v8  ;;  %v673_v28 = vpack.c.bf16 %v5421_v41, %v5416_v25 }
  0x5e   :  { %4366 = vmatmul.mubr.msk.bf16.gmra.mrb[4].mxu0 %vm169_vm0, %v672_v26  ;;  %v5464_v26 = vld [vmem:[%s6871_s2 + $0xd0] sm:$0xff] }
  0x5f   :  { %4369 = vmatprep.mubr.msk.bf16.mxu0 %vm169_vm0, %v673_v28  ;;  %v5469_v28 = vld [vmem:[%s6871_s2 + $0xe0] sm:$0xff] }
  0x60   :  { %v675_v9 = vpack.c.bf16 %v5469_v28, %v5464_v26 }
  0x66   :  { %4370 = vmatmul.mubr.msk.bf16.gmra.mrb[8].mxu0 %vm169_vm0, %v674_v59  ;;  %v5497_v59 = vld [vmem:[%s6871_s2 + $0x100] sm:$0xff] }
  0x67   :  { %4373 = vmatprep.mubr.msk.bf16.mxu0 %vm169_vm0, %v675_v9  ;;  %v127_v9 = vld [vmem:[%s6872_s3 + $0x10] sm:$0xff]  ;;  %v676_v52 = vpack.c.bf16 %v5497_v59, %v5492_v35 }
  0x68   :  { %v5509_v20 = vpack.c.bf16 %v127_v9, %v126_v10  ;;  %v131_v10 = vld [vmem:[%s6872_s3 + $0x50] sm:$0xff] }
  0x69   :  { %v5528_v9 = vpack.c.bf16 %v131_v10, %v130_v53  ;;  %v135_v53 = vld [vmem:[%s6872_s3 + $0xa0] sm:$0xff] }
  0x6a   :  { %6919 = vst [vmem:[#allocation18_spill] sm:$0xff] %v5509_v20 }
  0x6b   :  { %6921 = vst [vmem:[#allocation20_spill] sm:$0xff] %v5528_v9 }
  0x6e   :  { %4374 = vmatmul.mubr.msk.bf16.gmra.mrb[12].mxu0 %vm169_vm0, %v676_v52  ;;  %v5526_v52 = vpack.c.bf16 %v129_v30, %v128_v18  ;;  %v133_v30 = vld [vmem:[%s6872_s3 + $0x70] sm:$0xff] }
  0x6f   :  { %4379 = vmatprep.mubr.msk.bf16.mxu0 %vm169_vm0, %v5509_v20  ;;  %v5533_v20 = vld [vmem:[%s6873_s4 + $0x30] sm:$0xff]  }
  0x70   :  { %6920 = vst [vmem:[#allocation19_spill] sm:$0xff] %v5526_v52  ;;  %v134_v18 = vld [vmem:[%s6872_s3 + $0x90] sm:$0xff] }
  0x71   :  { %v5554_v10 = vpack.c.bf16 %v135_v53, %v134_v18  ;;  %v138_v53 = vld [vmem:[%s6872_s3 + $0xd0] sm:$0xff] }
  0x73   :  { %6923 = vst [vmem:[#allocation22_spill] sm:$0xff] %v5554_v10 }
  0x76   :  { %4380 = vmatmul.mubr.msk.bf16.vlgmr.msra.gmra.mrb[0].mxu0 %vm169_vm0, %v5526_v52  ;;  %v157_v52 = vpack.c.bf16 %v5454_v0, %v5441_v47 }
  0x77   :  { %4396 = vmatpush3.bf16.msra.mxu0 %v4932_v8  ;;  %4383 = vmatprep.mubr.msk.bf16.mxu0 %vm169_vm0, %v5528_v9  ;;  %v5552_v8 = vpack.c.bf16 %v133_v30, %v132_v51  ;;  %v85_v9 = vld [vmem:[%s6870_s1 + $0x90] sm:$0xff]  ;;  %v137_v30 = vld [vmem:[%s6872_s3 + $0xc0] sm:$0xff] }
  0x78   :  { %4413 = vmatprep.subr.bf16.mxu0 %v5533_v20  ;;  %v136_v51 = vld [vmem:[%s6872_s3 + $0xb0] sm:$0xff]  ;;  %v156_v18 = vpack.c.bf16 %v5436_v42, %v85_v9 }
  0x79   :  { %6922 = vst [vmem:[#allocation21_spill] sm:$0xff] %v5552_v8  ;;  %v5585_v21 = vpack.c.bf16 %v137_v30, %v136_v51  ;;  %v158_v51 = vpack.c.bf16 %v5481_v7, %v5459_v6  ;;  %v101_v30 = vld [vmem:[%s6871_s2 + $0x38] sm:$0x1] }
  0x7a   :  { %4315 = vmatprep.mubr.msk.bf16.mxu1 %vm169_vm0, %v156_v18  ;;  %v103_v18 = vld [vmem:[%s6871_s2 + $0x48] sm:$0x1] }
  0x7b   :  { %6924 = vst [vmem:[#allocation23_spill] sm:$0xff] %v5585_v21  ;;  %4316 = vmatmul.mubr.msk.bf16.vlgmr.msra.gmra.mrb[0].mxu1 %vm169_vm0, %v157_v52  ;;  %v159_v52 = vpack.c.bf16 %v5595_v32, %v5486_v48  ;;  %v1022_v49 = vrot.slane %v103_v18, 1 }
  0x7c   :  { %4319 = vmatprep.mubr.msk.bf16.mxu1 %vm169_vm0, %v158_v51  ;;  %v1021_v51 = vrot.slane %v5387_v62, 1  ;;  %v107_v62 = vld [vmem:[%s6871_s2 + $0x68] sm:$0x1] }
  0x7e   :  { %4384 = vmatmul.mubr.msk.bf16.gmra.mrb[4].mxu0 %vm169_vm0, %v5552_v8  ;;  %v139_v8 = vld [vmem:[%s6872_s3 + $0xe0] sm:$0xff] }
  0x7f   :  { %4387 = vmatprep.mubr.msk.bf16.mxu0 %vm169_vm0, %v5554_v10  ;;  %v95_v10 = vld [vmem:[%s6871_s2 + $0x8] sm:$0x1]  ;;  %v5588_v9 = vpack.c.bf16 %v139_v8, %v138_v53  ;;  %v1014_v8 = vsel %vm450_vm1, %v1012_v12, %v1013_v50  ;;  %v1015_v50 = vrot.slane %v5377_v60, 1  ;;  %v5627_v12 = vpack.c.bf16 %v141_v36, %v140_v22  ;;  %v111_v36 = vld [vmem:[%s6871_s2 + $0x98] sm:$0x1] }
  0x80   :  { %v1010_v54 = vrot.slane %v95_v10, 1  ;;  %v99_v10 = vld [vmem:[%s6871_s2 + $0x28] sm:$0x1]  ;;  %v1034_v18 = vrot.slane %v111_v36, 1  ;;  %v1045_v36 = vrot.slane %v5464_v26, 1 }
  0x81   :  { %6925 = vst [vmem:[#allocation24_spill] sm:$0xff] %v5588_v9  ;;  %v123_v26 = vld [vmem:[%s6871_s2 + $0xf8] sm:$0x1] }
  0x82   :  { %v1011_v55 = vsel %vm450_vm1, %v1009_v16, %v1010_v54  ;;  %v105_v54 = vld [vmem:[%s6871_s2 + $0x58] sm:$0x1]  ;;  %v1018_v16 = vrot.slane %v5382_v61, 1  ;;  %v1023_v61 = vsel %vm450_vm1, %v1021_v51, %v1022_v49  ;;  %v1027_v49 = vrot.slane %v5406_v23, 1  ;;  %v121_v51 = vld [vmem:[%s6871_s2 + $0xe8] sm:$0x1] }
  0x83   :  { %4320 = vmatmul.mubr.msk.bf16.gmra.mrb[4].mxu1 %vm169_vm0, %v159_v52  ;;  %v1073_v53 = vpack.c.bf16 %v1014_v8, %v1011_v55  ;;  %v1025_v34 = vrot.slane %v105_v54, 1  ;;  %v1028_v55 = vrot.slane %v107_v62, 1  ;;  %v1031_v8 = vrot.slane %v109_v63, 1 }
  0x85   :  { %v1026_v22 = vsel %vm450_vm1, %v1024_v33, %v1025_v34  ;;  %v1030_v33 = vrot.slane %v5411_v24, 1  ;;  %v1029_v23 = vsel %vm450_vm1, %v1027_v49, %v1028_v55  ;;  %v1051_v55 = vrot.slane %v5492_v35, 1 }
  0x86   :  { %4388 = vmatmul.mubr.msk.bf16.gmra.mrb[8].mxu0 %vm169_vm0, %v5585_v21  ;;  %v1019_v21 = vrot.slane %v101_v30, 1  ;;  %v1075_v34 = vpack.c.bf16 %v1026_v22, %v1023_v61  ;;  %v1036_v30 = vrot.slane %v5421_v41, 1  ;;  %v1042_v61 = vrot.slane %v5447_v58, 1 }
  0x87   :  { %4391 = vmatprep.mubr.msk.bf16.mxu0 %vm169_vm0, %v5588_v9  ;;  %v1016_v9 = vrot.slane %v99_v10, 1  ;;  %v1033_v10 = vrot.slane %v5416_v25, 1  ;;  %v1032_v24 = vsel %vm450_vm1, %v1030_v33, %v1031_v8  ;;  %v6926_v35 = vpack.c.bf16 %v5141_v27, %v5124_v19  ;;  %v56_v19 = vld [vmem:[%s6869_s0 + $0x80] sm:$0xff] }
  0x88   :  { %v1020_v52 = vsel %vm450_vm1, %v1018_v16, %v1019_v21  ;;  %v113_v21 = vld [vmem:[%s6871_s2 + $0xa8] sm:$0x1]  ;;  %v115_v16 = vld [vmem:[%s6871_s2 + $0xb8] sm:$0x1]  ;;  %v1230_v27 = vpack.c.bf16 %v56_v19, %v5176_v38 }
  0x89   :  { %v1017_v60 = vsel %vm450_vm1, %v1015_v50, %v1016_v9  ;;  %v1037_v54 = vrot.slane %v113_v21, 1  ;;  %v4934_v50 = vld [vmem:[%s6873_s4 + $0x38] sm:$0xff]   ;;  %v1035_v25 = vsel %vm450_vm1, %v1033_v10, %v1034_v18  ;;  %v1040_v62 = vrot.slane %v115_v16, 1 }
  0x8a   :  { %v1074_v9 = vpack.c.bf16 %v1020_v52, %v1017_v60  ;;  %v1039_v60 = vrot.slane %v5431_v39, 1  ;;  %v1076_v52 = vpack.c.bf16 %v1032_v24, %v1029_v23  ;;  %v1048_v21 = vrot.slane %v5469_v28, 1  ;;  %v125_v28 = vld [vmem:[%s6871_s2 + $0x108] sm:$0x1] }
  0x8b   :  { %v1038_v41 = vsel %vm450_vm1, %v1036_v30, %v1037_v54  ;;  %v1054_v10 = vrot.slane %v5497_v59, 1  ;;  %v1052_v18 = vrot.slane %v123_v26, 1  ;;  %v1055_v54 = vrot.slane %v125_v28, 1  ;;  %v4935_v59 = vld [vmem:[%s6873_s4 + $0x40] sm:$0xff]  }
  0x8c   :  { %v1077_v22 = vpack.c.bf16 %v1038_v41, %v1035_v25  ;;  %v1041_v33 = vsel %vm450_vm1, %v1039_v60, %v1040_v62  ;;  %v6927_v41 = vpack.c.bf16 %v5116_v17, %v5108_v15  ;;  %v6928_v16 = vpack.c.bf16 %v5171_v37, %v5149_v29  ;;  %v74_v37 = vld [vmem:[%s6869_s0 + $0x110] sm:$0xff]  ;;  %v6945_v60 = vld [vmem:[#allocation13_spill] sm:$0xff]  ;;  %v6947_v62 = vld [vmem:[#allocation15_spill] sm:$0xff] }
  0x8d   :  { %v1053_v23 = vsel %vm450_vm1, %v1051_v55, %v1052_v18  ;;  %v1056_v24 = vsel %vm450_vm1, %v1054_v10, %v1055_v54  ;;  %v6929_v15 = vpack.c.bf16 %v5197_v43, %v5186_v40  ;;  %v6930_v17 = vpack.c.bf16 %v5207_v45, %v5202_v44  ;;  %v84_v45 = vld [vmem:[%s6870_s1 + $0x80] sm:$0xff]  ;;  %v4936_v54 = vld [vmem:[%s6874_s5 + $0x10] sm:$0xff]  }
  0x8e   :  { %4392 = vmatmul.mubr.msk.bf16.gmra.mrb[12].mxu0 %vm169_vm0, %v5627_v12  ;;  %v1080_v25 = vpack.c.bf16 %v1056_v24, %v1053_v23  ;;  %v6931_v29 = vpack.c.bf16 %v5230_v56, %v5212_v46  ;;  %v1234_v38 = vpack.c.bf16 %v74_v37, %v5235_v57  ;;  %v6932_v40 = vpack.c.bf16 %v5063_v3, %v5058_v2  ;;  %v6937_v56 = vld [vmem:[#allocation8_spill] sm:$0xff]  ;;  %v6938_v57 = vld [vmem:[#allocation9_spill] sm:$0xff]  ;;  %v5869_v24 = vld [vmem:[%s6874_s5] sm:$0xff]  }
  0x8f   :  { %4397 = vmatprep.mubr.msk.bf16.mxu0 %vm169_vm0, %v1073_v53  ;;  %v117_v53 = vld [vmem:[%s6871_s2 + $0xc8] sm:$0x1]  ;;  %v1383_v43 = vpack.c.bf16 %v5096_v13, %v5088_v11  ;;  %v6933_v44 = vpack.c.bf16 %v5073_v5, %v5068_v4  ;;  %v1384_v46 = vpack.c.bf16 %v84_v45, %v5102_v14  ;;  %v6934_v2 = vpack.c.bf16 %v5441_v47, %v5436_v42  ;;  %v93_v5 = vld [vmem:[%s6870_s1 + $0x110] sm:$0xff]  ;;  %v4937_v23 = vld [vmem:[%s6874_s5 + $0x18] sm:$0xff]  }
  0x90   :  { %v1043_v63 = vrot.slane %v117_v53, 1  ;;  %v6935_v3 = vpack.c.bf16 %v5459_v6, %v5454_v0  ;;  %v6936_v4 = vpack.c.bf16 %v5486_v48, %v5481_v7  ;;  %v1388_v11 = vpack.c.bf16 %v93_v5, %v5595_v32  ;;  %v57_v14 = vld [vmem:[%s6869_s0 + $0x88] sm:$0x1]  ;;  %v6940_v0 = vld [vmem:[#allocation6_spill] sm:$0xff]  ;;  %v6944_v53 = vld [vmem:[#allocation12_spill] sm:$0xff]  ;;  %4467 = vmatprep.subr.bf16.mxu1 %v4936_v54 }
  0x91   :  { %v1547_v13 = vpack.c.bf16 %v5273_v31, %v5254_v1  ;;  %v1539_v7 = vrot.slane %v56_v19, 1  ;;  %v1549_v48 = vpack.c.bf16 %v6938_v57, %v6937_v56  ;;  %v1540_v42 = vrot.slane %v57_v14, 1  ;;  %v6939_v47 = vld [vmem:[#allocation7_spill] sm:$0xff]  ;;  %v6942_v1 = vld [vmem:[#allocation10_spill] sm:$0xff]  ;;  %4468 = vmatpush3.bf16.msra.mxu1 %v4936_v54 }
  0x92   :  { %v1044_v39 = vsel %vm450_vm1, %v1042_v61, %v1043_v63  ;;  %v6941_v6 = vpack.c.bf16 %v6939_v47, %v6940_v0  ;;  %v6948_v63 = vld [vmem:[#allocation16_spill] sm:$0xff]  ;;  %v4985_v18 = vmov 0.0   ;;  %4469 = vmatprep.subr.bf16.mxu1 %v4937_v23 }
  0x93   :  { %v1078_v8 = vpack.c.bf16 %v1044_v39, %v1041_v33  ;;  %v1541_v32 = vsel %vm450_vm1, %v1539_v7, %v1540_v42  ;;  %v6950_v39 = vld [vmem:[#allocation18_spill] sm:$0xff]  ;;  %1891 = vst.msk [vmem:[#allocation2 + $0x100] sm:$0xff] %vm1701_vm2, %v4985_v18  ;;  %1858 = vst.msk [vmem:[#allocation2] sm:$0xff] %vm1701_vm2, %v4985_v18 }
  0x94   :  { %v1550_v31 = vpack.c.bf16 %v1541_v32, %v6942_v1  ;;  %1892 = vst.msk [vmem:[#allocation2 + $0x108] sm:$0x3] %vm1859_vm3, %v4985_v18  ;;  %1860 = vst.msk [vmem:[#allocation2 + $0x8] sm:$0x3] %vm1859_vm3, %v4985_v18 }
  0x95   :  { %1861 = vst.msk [vmem:[#allocation2 + $0x10] sm:$0xff] %vm1701_vm2, %v4985_v18  ;;  %1863 = vst.msk [vmem:[#allocation2 + $0x20] sm:$0xff] %vm1701_vm2, %v4985_v18  ;;  %4470 = vmatpush3.bf16.msra.mxu1 %v4937_v23 }
  0x96   :  { %4398 = vmatmul.mubr.msk.bf16.vlgmr.msra.gmra.mrb[0].mxu0 %vm169_vm0, %v1074_v9  ;;  %v1049_v9 = vrot.slane %v121_v51, 1  ;;  %v75_v51 = vld [vmem:[%s6869_s0 + $0x118] sm:$0x1]  ;;  %1862 = vst.msk [vmem:[#allocation2 + $0x18] sm:$0x3] %vm1859_vm3, %v4985_v18  ;;  %4487 = vmatprep.subr.bf16.mxu1 %v5869_v24 }
  0x97   :  { %4414 = vmatpush3.bf16.msra.mxu0 %v5533_v20  ;;  %4401 = vmatprep.mubr.msk.bf16.mxu0 %vm169_vm0, %v1075_v34  ;;  %v119_v20 = vld [vmem:[%s6871_s2 + $0xd8] sm:$0x1]  ;;  %1864 = vst.msk [vmem:[#allocation2 + $0x28] sm:$0x3] %vm1859_vm3, %v4985_v18  ;;  %1866 = vst.msk [vmem:[#allocation2 + $0x38] sm:$0x3] %vm1859_vm3, %v4985_v18 }
  0x98   :  { %4431 = vmatprep.subr.bf16.mxu0 %v4934_v50  ;;  %v1046_v49 = vrot.slane %v119_v20, 1  ;;  %v1050_v58 = vsel %vm450_vm1, %v1048_v21, %v1049_v9  ;;  %v1543_v21 = vrot.slane %v75_v51, 1  ;;  %v6949_v9 = vld [vmem:[#allocation17_spill] sm:$0xff]  ;;  %1865 = vst.msk [vmem:[#allocation2 + $0x30] sm:$0xff] %vm1701_vm2, %v4985_v18  ;;  %1867 = vst.msk [vmem:[#allocation2 + $0x40] sm:$0xff] %vm1701_vm2, %v4985_v18 }
  0x99   :  { %1868 = vst.msk [vmem:[#allocation2 + $0x48] sm:$0x3] %vm1859_vm3, %v4985_v18  ;;  %1870 = vst.msk [vmem:[#allocation2 + $0x58] sm:$0x3] %vm1859_vm3, %v4985_v18 }
  0x9a   :  { %v1047_v34 = vsel %vm450_vm1, %v1045_v36, %v1046_v49  ;;  %v1553_v36 = vpack.c.bf16 %v6948_v63, %v6947_v62  ;;  %1869 = vst.msk [vmem:[#allocation2 + $0x50] sm:$0xff] %vm1701_vm2, %v4985_v18  ;;  %1871 = vst.msk [vmem:[#allocation2 + $0x60] sm:$0xff] %vm1701_vm2, %v4985_v18 }
  0x9b   :  { %v1079_v30 = vpack.c.bf16 %v1050_v58, %v1047_v34  ;;  %1872 = vst.msk [vmem:[#allocation2 + $0x68] sm:$0x3] %vm1859_vm3, %v4985_v18  ;;  %1874 = vst.msk [vmem:[#allocation2 + $0x78] sm:$0x3] %vm1859_vm3, %v4985_v18 }
  0x9c   :  { %1873 = vst.msk [vmem:[#allocation2 + $0x70] sm:$0xff] %vm1701_vm2, %v4985_v18  ;;  %1875 = vst.msk [vmem:[#allocation2 + $0x80] sm:$0xff] %vm1701_vm2, %v4985_v18 }
  0x9d   :  { %1876 = vst.msk [vmem:[#allocation2 + $0x88] sm:$0x3] %vm1859_vm3, %v4985_v18  ;;  %1878 = vst.msk [vmem:[#allocation2 + $0x98] sm:$0x3] %vm1859_vm3, %v4985_v18 }
  0x9e   :  { %4402 = vmatmul.mubr.msk.bf16.gmra.mrb[4].mxu0 %vm169_vm0, %v1076_v52  ;;  %v6946_v52 = vld [vmem:[#allocation14_spill] sm:$0xff]  ;;  %1877 = vst.msk [vmem:[#allocation2 + $0x90] sm:$0xff] %vm1701_vm2, %v4985_v18  ;;  %1879 = vst.msk [vmem:[#allocation2 + $0xa0] sm:$0xff] %vm1701_vm2, %v4985_v18 }
  0x9f   :  { %4405 = vmatprep.mubr.msk.bf16.mxu0 %vm169_vm0, %v1077_v22  ;;  %v1552_v61 = vpack.c.bf16 %v6946_v52, %v6945_v60  ;;  %v1542_v22 = vrot.slane %v74_v37, 1  ;;  %1880 = vst.msk [vmem:[#allocation2 + $0xa8] sm:$0x3] %vm1859_vm3, %v4985_v18  ;;  %1882 = vst.msk [vmem:[#allocation2 + $0xb8] sm:$0x3] %vm1859_vm3, %v4985_v18 }
  0xa0   :  { %1881 = vst.msk [vmem:[#allocation2 + $0xb0] sm:$0xff] %vm1701_vm2, %v4985_v18  ;;  %1883 = vst.msk [vmem:[#allocation2 + $0xc0] sm:$0xff] %vm1701_vm2, %v4985_v18 }
  0xa1   :  { %v1544_v49 = vsel %vm450_vm1, %v1542_v22, %v1543_v21  ;;  %1884 = vst.msk [vmem:[#allocation2 + $0xc8] sm:$0x3] %vm1859_vm3, %v4985_v18  ;;  %1886 = vst.msk [vmem:[#allocation2 + $0xd8] sm:$0x3] %vm1859_vm3, %v4985_v18 }
  0xa2   :  { %v1554_v33 = vpack.c.bf16 %v1544_v49, %v6949_v9  ;;  %1885 = vst.msk [vmem:[#allocation2 + $0xd0] sm:$0xff] %vm1701_vm2, %v4985_v18  ;;  %1887 = vst.msk [vmem:[#allocation2 + $0xe0] sm:$0xff] %vm1701_vm2, %v4985_v18 }
  0xa3   :  { %1888 = vst.msk [vmem:[#allocation2 + $0xe8] sm:$0x3] %vm1859_vm3, %v4985_v18  ;;  %1890 = vst.msk [vmem:[#allocation2 + $0xf8] sm:$0x3] %vm1859_vm3, %v4985_v18 }
  0xa4   :  { %1889 = vst.msk [vmem:[#allocation2 + $0xf0] sm:$0xff] %vm1701_vm2, %v4985_v18  ;;  %1893 = vst.msk [vmem:[#allocation2 + $0x110] sm:$0xff] %vm1701_vm2, %v4985_v18 }
  0xa5   :  { %1894 = vst.msk [vmem:[#allocation2 + $0x118] sm:$0x3] %vm1859_vm3, %v4985_v18  ;;  %1896 = vst.msk [vmem:[#allocation2 + $0x128] sm:$0x3] %vm1859_vm3, %v4985_v18 }
  0xa6   :  { %4406 = vmatmul.mubr.msk.bf16.gmra.mrb[8].mxu0 %vm169_vm0, %v1078_v8  ;;  %1895 = vst.msk [vmem:[#allocation2 + $0x120] sm:$0xff] %vm1701_vm2, %v4985_v18  ;;  %1897 = vst.msk [vmem:[#allocation2 + $0x130] sm:$0xff] %vm1701_vm2, %v4985_v18 }
  0xa7   :  { %4409 = vmatprep.mubr.msk.bf16.mxu0 %vm169_vm0, %v1079_v30  ;;  %1898 = vst.msk [vmem:[#allocation2 + $0x138] sm:$0x3] %vm1859_vm3, %v4985_v18 }
  0xae   :  { %4410 = vmatmul.mubr.msk.bf16.gmra.mrb[12].mxu0 %vm169_vm0, %v1080_v25  ;;  %v5872_v25 = vld [vmem:[#allocation2 + $0xa0] sm:$0xff] }
  0xaf   :  { %4415 = vmatprep.mubr.msk.bf16.mxu0 %vm169_vm0, %v6926_v35  ;;  %v5874_v35 = vld [vmem:[#allocation2 + $0xa8] sm:$0x3] }
  0xb6   :  { %4416 = vmatmul.mubr.msk.bf16.vlgmr.msra.gmra.mrb[0].mxu0 %vm169_vm0, %v6927_v41  ;;  %v2369_v41 = vrot.slane %v5874_v35, 2 }
  0xb7   :  { %4432 = vmatpush3.bf16.msra.mxu0 %v4934_v50  ;;  %4419 = vmatprep.mubr.msk.bf16.mxu0 %vm169_vm0, %v6928_v16  ;;  %v6943_v50 = vld [vmem:[#allocation11_spill] sm:$0xff] }
  0xb8   :  { %4449 = vmatprep.subr.bf16.mxu0 %v4935_v59  ;;  %v1551_v20 = vpack.c.bf16 %v6944_v53, %v6943_v50 }
  0xbe   :  { %4420 = vmatmul.mubr.msk.bf16.gmra.mrb[4].mxu0 %vm169_vm0, %v1230_v27 }
  0xbf   :  { %4423 = vmatprep.mubr.msk.bf16.mxu0 %vm169_vm0, %v6929_v15 }
  0xc6   :  { %4424 = vmatmul.mubr.msk.bf16.gmra.mrb[8].mxu0 %vm169_vm0, %v6930_v17 }
  0xc7   :  { %4427 = vmatprep.mubr.msk.bf16.mxu0 %vm169_vm0, %v6931_v29 }
  0xce   :  { %4428 = vmatmul.mubr.msk.bf16.gmra.mrb[12].mxu0 %vm169_vm0, %v1234_v38 }
  0xcf   :  { %4433 = vmatprep.mubr.msk.bf16.mxu0 %vm169_vm0, %v6932_v40 }
  0xd6   :  { %4434 = vmatmul.mubr.msk.bf16.vlgmr.msra.gmra.mrb[0].mxu0 %vm169_vm0, %v6933_v44 }
  0xd7   :  { %4450 = vmatpush3.bf16.msra.mxu0 %v4935_v59  ;;  %4437 = vmatprep.mubr.msk.bf16.mxu0 %vm169_vm0, %v1383_v43  ;;  %v2368_v59 = vrot.slane %v5872_v25, 2 }
  0xd9   :  { %v5879_v16 = vsel %vm2343_vm4, %v2368_v59, %v2369_v41 }
  0xde   :  { %4438 = vmatmul.mubr.msk.bf16.gmra.mrb[4].mxu0 %vm169_vm0, %v1384_v46 }
  0xdf   :  { %4441 = vmatprep.mubr.msk.bf16.mxu0 %vm169_vm0, %v6934_v2 }
  0xe6   :  { %4442 = vmatmul.mubr.msk.bf16.gmra.mrb[8].mxu0 %vm169_vm0, %v6935_v3 }
  0xe7   :  { %4445 = vmatprep.mubr.msk.bf16.mxu0 %vm169_vm0, %v6936_v4 }
  0xee   :  { %4446 = vmatmul.mubr.msk.bf16.gmra.mrb[12].mxu0 %vm169_vm0, %v1388_v11 }
  0xef   :  { %4451 = vmatprep.mubr.msk.bf16.mxu0 %vm169_vm0, %v1547_v13 }
  0xf6   :  { %4452 = vmatmul.mubr.msk.bf16.vlgmr.msra.gmra.mrb[0].mxu0 %vm169_vm0, %v6941_v6 }
  0xf7   :  { %4455 = vmatprep.mubr.msk.bf16.mxu0 %vm169_vm0, %v1549_v48 }
  0xfe   :  { %4456 = vmatmul.mubr.msk.bf16.gmra.mrb[4].mxu0 %vm169_vm0, %v1550_v31 }
  0xff   :  { %4459 = vmatprep.mubr.msk.bf16.mxu0 %vm169_vm0, %v1551_v20 }
 0x106   :  { %4460 = vmatmul.mubr.msk.bf16.gmra.mrb[8].mxu0 %vm169_vm0, %v1552_v61 }
 0x107   :  { %4463 = vmatprep.mubr.msk.bf16.mxu0 %vm169_vm0, %v1553_v36 }
 0x10e   :  { %4464 = vmatmul.mubr.msk.bf16.gmra.mrb[12].mxu0 %vm169_vm0, %v1554_v33 }
 0x10f   :  { %4649 = vmatprep.mubr.msk.bf16.mxu0 %vm169_vm0, %v6950_v39 }
 0x14e   :  { %v5804_v34 = vpop.f32.mrb[0].mxu1 }
 0x14f   :  { %v5806_v58 = vpop.f32.mrb[1].mxu1 }
 0x150   :  { %v5808_v26 = vpop.f32.mrb[2].mxu1 }
 0x151   :  { %v5810_v28 = vpop.f32.mrb[3].mxu1 }
 0x156   :  { %v5812_v55 = vpop.f32.mrb[4].mxu1 }
 0x157   :  { %v5814_v8 = vpop.f32.mrb[5].mxu1 }
 0x158   :  { %v5816_v10 = vpop.f32.mrb[6].mxu1 }
 0x159   :  { %v5818_v30 = vpop.f32.mrb[7].mxu1 }
 0x1c9   :  { %v5881_v19 = vpop.f32.mrb[0].mxu0 }
 0x1ca   :  { %v5883_v27 = vpop.f32.mrb[1].mxu0  ;;  %v1742_v37 = vmul.f32 %v5881_v19, %v5881_v19  ;;  %v1705_v45 = vsel %vm1701_vm2, %v5881_v19, 0.0 }
 0x1cb   :  { %v1740_v15 = vmul.f32 %v5883_v27, %v5883_v27  ;;  %v5887_v17 = vpop.f32.mrb[2].mxu0  ;;  %v1702_v38 = vsel %vm1701_vm2, %v5883_v27, 0.0 }
 0x1cc   :  { %v5889_v29 = vpop.f32.mrb[3].mxu0  ;;  %v1743_v2 = vmul.f32 %v5887_v17, %v5887_v17  ;;  %v1759_v11 = vsel %vm1701_vm2, %v1742_v37, 0.0  ;;  %v1707_v13 = vsel %vm1701_vm2, %v5887_v17, 0.0 }
 0x1cd   :  { %v1703_v40 = vsel %vm1701_vm2, %v5889_v29, 0.0  ;;  %v1741_v43 = vmul.f32 %v5889_v29, %v5889_v29  ;;  %v1756_v46 = vsel %vm1701_vm2, %v1740_v15, 0.0 }
 0x1ce   :  { %v1704_v44 = vadd.f32 %v1703_v40, %v1702_v38  ;;  %v1761_v48 = vsel %vm1701_vm2, %v1743_v2, 0.0 }
 0x1cf   :  { %v1757_v3 = vsel %vm1701_vm2, %v1741_v43, 0.0 }
 0x1d0   :  { %v1706_v4 = vadd.f32 %v1705_v45, %v1704_v44  ;;  %v1758_v5 = vadd.f32 %v1757_v3, %v1756_v46 }
 0x1d1   :  { %v5908_v14 = vpop.f32.mrb[4].mxu0 }
 0x1d2   :  { %v1760_v7 = vadd.f32 %v1759_v11, %v1758_v5  ;;  %v5910_v56 = vpop.f32.mrb[5].mxu0  ;;  %v1708_v57 = vadd.f32 %v1707_v13, %v1706_v4  ;;  %v1746_v31 = vmul.f32 %v5908_v14, %v5908_v14  ;;  %v1713_v52 = vsel %vm1701_vm2, %v5908_v14, 0.0 }
 0x1d3   :  { %v1709_v42 = vsel %vm1701_vm2, %v5910_v56, 0.0  ;;  %v1744_v47 = vmul.f32 %v5910_v56, %v5910_v56  ;;  %v5917_v0 = vpop.f32.mrb[6].mxu0 }
 0x1d4   :  { %v1710_v6 = vadd.f32 %v1709_v42, %v1708_v57  ;;  %v1762_v32 = vadd.f32 %v1761_v48, %v1760_v7  ;;  %v5919_v1 = vpop.f32.mrb[7].mxu0  ;;  %v1747_v61 = vmul.f32 %v5917_v0, %v5917_v0  ;;  %v1767_v36 = vsel %vm1701_vm2, %v1746_v31, 0.0 }
 0x1d5   :  { %v1763_v50 = vsel %vm1701_vm2, %v1744_v47, 0.0  ;;  %v1711_v53 = vsel %vm1701_vm2, %v5919_v1, 0.0  ;;  %v1745_v20 = vmul.f32 %v5919_v1, %v5919_v1  ;;  %v1715_v21 = vsel %vm1701_vm2, %v5917_v0, 0.0 }
 0x1d6   :  { %v1764_v51 = vadd.f32 %v1763_v50, %v1762_v32  ;;  %v1712_v60 = vadd.f32 %v1711_v53, %v1710_v6  ;;  %v1769_v54 = vsel %vm1701_vm2, %v1747_v61, 0.0 }
 0x1d7   :  { %v1765_v22 = vsel %vm1701_vm2, %v1745_v20, 0.0 }
 0x1d8   :  { %v1714_v62 = vadd.f32 %v1713_v52, %v1712_v60  ;;  %v1766_v63 = vadd.f32 %v1765_v22, %v1764_v51 }
 0x1d9   :  { %v4461_v49 = vpop.f32.mrb[8].mxu0 }
 0x1da   :  { %v1768_v9 = vadd.f32 %v1767_v36, %v1766_v63  ;;  %v5937_v33 = vadd.f32 %v4461_v49, %v5804_v34  ;;  %v1654_v39 = vpop.f32.mrb[9].mxu0  ;;  %v1716_v18 = vadd.f32 %v1715_v21, %v1714_v62 }
 0x1db   :  { %v5941_v23 = vadd.f32 %v1654_v39, %v5806_v58  ;;  %v4462_v59 = vpop.f32.mrb[10].mxu0 }
 0x1dc   :  { %v1770_v41 = vadd.f32 %v1769_v54, %v1768_v9  ;;  %v5944_v15 = vadd.f32 %v4462_v59, %v5808_v26  ;;  %v1657_v37 = vpop.f32.mrb[11].mxu0  ;;  %v1750_v58 = vmul.f32 %v5937_v33, %v5937_v33 }
 0x1dd   :  { %v1717_v38 = vsel %vm1701_vm2, %v5941_v23, 0.0  ;;  %v1748_v34 = vmul.f32 %v5941_v23, %v5941_v23  ;;  %v5951_v40 = vadd.f32 %v1657_v37, %v5810_v28  ;;  %v1721_v28 = vsel %vm1701_vm2, %v5937_v33, 0.0 }
 0x1de   :  { %v1718_v43 = vadd.f32 %v1717_v38, %v1716_v18  ;;  %v1751_v2 = vmul.f32 %v5944_v15, %v5944_v15  ;;  %v1775_v48 = vsel %vm1701_vm2, %v1750_v58, 0.0  ;;  %v1723_v42 = vsel %vm1701_vm2, %v5944_v15, 0.0 }
 0x1df   :  { %v1771_v44 = vsel %vm1701_vm2, %v1748_v34, 0.0  ;;  %v1719_v26 = vsel %vm1701_vm2, %v5951_v40, 0.0  ;;  %v1749_v45 = vmul.f32 %v5951_v40, %v5951_v40 }
 0x1e0   :  { %v1772_v46 = vadd.f32 %v1771_v44, %v1770_v41  ;;  %v1720_v3 = vadd.f32 %v1719_v26, %v1718_v43  ;;  %v1777_v32 = vsel %vm1701_vm2, %v1751_v2, 0.0 }
 0x1e1   :  { %v1773_v4 = vsel %vm1701_vm2, %v1749_v45, 0.0  ;;  %v4465_v5 = vpop.f32.mrb[12].mxu0 }
 0x1e2   :  { %v1722_v11 = vadd.f32 %v1721_v28, %v1720_v3  ;;  %v1774_v13 = vadd.f32 %v1773_v4, %v1772_v46  ;;  %v5966_v7 = vadd.f32 %v4465_v5, %v5812_v55  ;;  %v1670_v57 = vpop.f32.mrb[13].mxu0 }
 0x1e3   :  { %v5972_v47 = vadd.f32 %v1670_v57, %v5814_v8  ;;  %v4466_v6 = vpop.f32.mrb[14].mxu0 }
 0x1e4   :  { %v1776_v31 = vadd.f32 %v1775_v48, %v1774_v13  ;;  %v1724_v50 = vadd.f32 %v1723_v42, %v1722_v11  ;;  %v1673_v53 = vpop.f32.mrb[15].mxu0  ;;  %v5980_v51 = vadd.f32 %v4466_v6, %v5816_v10  ;;  %v1754_v62 = vmul.f32 %v5966_v7, %v5966_v7 }
 0x1e5   :  { %v1725_v20 = vsel %vm1701_vm2, %v5972_v47, 0.0  ;;  %v1752_v55 = vmul.f32 %v5972_v47, %v5972_v47  ;;  %v4674_v60 = vadd.f32 %v1673_v53, %v5818_v30  ;;  %v1729_v49 = vsel %vm1701_vm2, %v5966_v7, 0.0 }
 0x1e6   :  { %v1726_v52 = vadd.f32 %v1725_v20, %v1724_v50  ;;  %v1778_v8 = vadd.f32 %v1777_v32, %v1776_v31  ;;  %v1755_v10 = vmul.f32 %v5980_v51, %v5980_v51  ;;  %v1731_v39 = vsel %vm1701_vm2, %v5980_v51, 0.0  ;;  %v1798_v31 = vld [vmem:[%s6875_s6] sm:$0x1] }
 0x1e7   :  { %v1779_v61 = vsel %vm1701_vm2, %v1752_v55, 0.0  ;;  %v1727_v22 = vsel %vm1701_vm2, %v4674_v60, 0.0  ;;  %v1753_v21 = vmul.f32 %v4674_v60, %v4674_v60  ;;  %v1783_v54 = vsel %vm1701_vm2, %v1754_v62, 0.0 }
 0x1e8   :  { %v1780_v63 = vadd.f32 %v1779_v61, %v1778_v8  ;;  %v1728_v36 = vadd.f32 %v1727_v22, %v1726_v52  ;;  %v1785_v37 = vsel %vm1701_vm2, %v1755_v10, 0.0  ;;  %v1802_v6 = vlaneseq  ;;  %v6001_v52 = vld [vmem:[#allocation2] sm:$0xff]  ;;  %v6003_v8 = vld [vmem:[#allocation2 + $0x8] sm:$0x3] }
 0x1e9   :  { %v1781_v30 = vsel %vm1701_vm2, %v1753_v21, 0.0  ;;  %v2000_v62 = vrot.slane %v6001_v52, 1 }
 0x1ea   :  { %v1730_v9 = vadd.f32 %v1729_v49, %v1728_v36  ;;  %v1782_v18 = vadd.f32 %v1781_v30, %v1780_v63  ;;  %v1803_v32 = vshrl.u32 %v1802_v6, 7  ;;  %v2001_v63 = vrot.slane %v6003_v8, 1 }
 0x1ec   :  { %v1732_v59 = vadd.f32 %v1731_v39, %v1730_v9  ;;  %v1784_v41 = vadd.f32 %v1783_v54, %v1782_v18  ;;  %v5999_v50 = vsub.s32 0, %v1803_v32 }
 0x1ee   :  { %v1733_v38 = vrot.slane %v1732_v59, 4  ;;  %v1786_v34 = vadd.f32 %v1785_v37, %v1784_v41  ;;  %6951 = vst [vmem:[#allocation8_spill] sm:$0xff] %v5999_v50 }
 0x1f0   :  { %v1734_v43 = vadd.f32 %v1733_v38, %v1732_v59  ;;  %v1787_v58 = vrot.slane %v1786_v34, 4 }
 0x1f2   :  { %v1735_v44 = vrot.slane %v1734_v43, 2  ;;  %v1788_v26 = vadd.f32 %v1787_v58, %v1786_v34 }
 0x1f4   :  { %v1736_v45 = vadd.f32 %v1735_v44, %v1734_v43  ;;  %v1789_v46 = vrot.slane %v1788_v26, 2 }
 0x1f6   :  { %v1737_v2 = vrot.slane %v1736_v45, 1  ;;  %v1790_v3 = vadd.f32 %v1789_v46, %v1788_v26 }
 0x1f8   :  { %v1738_v28 = vadd.f32 %v1737_v2, %v1736_v45  ;;  %v1791_v4 = vrot.slane %v1790_v3, 1 }
 0x1fa   :  { %v1739_v5 = vmul.f32 0.0078125, %v1738_v28  ;;  %v1792_v11 = vadd.f32 %v1791_v4, %v1790_v3 }
 0x1fc   :  { %v1794_v13 = vmul.f32 %v1739_v5, %v1739_v5  ;;  %v1793_v57 = vmul.f32 0.0078125, %v1792_v11  ;;  %v1800_v55 = vsub.f32 0.0, %v1739_v5 }
 0x1fe   :  { %v1795_v48 = vsub.f32 %v1793_v57, %v1794_v13 }
 0x200   :  { %v1796_v42 = vadd.f32 1e-05, %v1795_v48 }
 0x202   :  { %4955 = vrsqrt.f32 %v1796_v42 }
 0x20c   :  { %v4956_v53 = vpop.eup %4955 }
 0x20d   :  { %v1799_v20 = vmul.f32 %v4956_v53, %v1798_v31 }
 0x20f   :  { %v1801_v61 = vmul.f32 %v1800_v55, %v1799_v20  ;;  %v1805_v22 = vrot.slane %v1799_v20, %v5999_v50 }
 0x211   :  { %v1819_v36 = vmul.f32 %v4674_v60, %v1805_v22  ;;  %v1825_v21 = vrot.slane %v1801_v61, %v5999_v50  ;;  %v1806_v49 = vmul.f32 %v1805_v22, %v5883_v27  ;;  %v1807_v10 = vmul.f32 %v1805_v22, %v5889_v29 }
 0x212   :  { %v1808_v9 = vmul.f32 %v5881_v19, %v1805_v22  ;;  %v1809_v30 = vmul.f32 %v5887_v17, %v1805_v22  ;;  %v1810_v39 = vmul.f32 %v1805_v22, %v5910_v56  ;;  %v1811_v18 = vmul.f32 %v1805_v22, %v5919_v1 }
 0x213   :  { %v1839_v54 = vadd.f32 %v1825_v21, %v1819_v36  ;;  %v1826_v59 = vadd.f32 %v1825_v21, %v1806_v49  ;;  %v1827_v41 = vadd.f32 %v1825_v21, %v1807_v10  ;;  %v1812_v37 = vmul.f32 %v5908_v14, %v1805_v22 }
 0x214   :  { %v1828_v60 = vadd.f32 %v1825_v21, %v1808_v9  ;;  %v1829_v38 = vadd.f32 %v1825_v21, %v1809_v30  ;;  %v1830_v34 = vadd.f32 %v1825_v21, %v1810_v39  ;;  %v1831_v43 = vadd.f32 %v1825_v21, %v1811_v18 }
 0x215   :  { %v1855_v27 = vmax.f32 %v1839_v54, 0.0  ;;  %v1842_v58 = vmax.f32 %v1826_v59, 0.0  ;;  %v1843_v29 = vmax.f32 %v1827_v41, 0.0  ;;  %v1832_v44 = vadd.f32 %v1825_v21, %v1812_v37 }
 0x216   :  { %v1844_v19 = vmax.f32 %v1828_v60, 0.0  ;;  %v1845_v26 = vmax.f32 %v1829_v38, 0.0  ;;  %v1846_v17 = vmax.f32 %v1830_v34, 0.0  ;;  %v1847_v45 = vmax.f32 %v1831_v43, 0.0 }
 0x217   :  { %1913 = vst.msk [vmem:[#allocation2 + $0x101] sm:$0xff] %vm1701_vm2, %v1855_v27  ;;  %1900 = vst.msk [vmem:[#allocation2 + $0x11] sm:$0xff] %vm1701_vm2, %v1842_v58  ;;  %v1848_v56 = vmax.f32 %v1832_v44, 0.0  ;;  %v1814_v14 = vmul.f32 %v5941_v23, %v1805_v22  ;;  %v1815_v1 = vmul.f32 %v5951_v40, %v1805_v22  ;;  %v1816_v46 = vmul.f32 %v5937_v33, %v1805_v22 }
 0x218   :  { %1901 = vst.msk [vmem:[#allocation2 + $0x21] sm:$0xff] %vm1701_vm2, %v1843_v29  ;;  %1902 = vst.msk [vmem:[#allocation2 + $0x31] sm:$0xff] %vm1701_vm2, %v1844_v19  ;;  %v1817_v2 = vmul.f32 %v5944_v15, %v1805_v22  ;;  %v1818_v3 = vmul.f32 %v5972_v47, %v1805_v22  ;;  %v1820_v28 = vmul.f32 %v5966_v7, %v1805_v22  ;;  %v2024_v61 = vrot.slane %v5872_v25, 1 }
 0x219   :  { %1903 = vst.msk [vmem:[#allocation2 + $0x41] sm:$0xff] %vm1701_vm2, %v1845_v26  ;;  %1904 = vst.msk [vmem:[#allocation2 + $0x51] sm:$0xff] %vm1701_vm2, %v1846_v17  ;;  %v1813_v23 = vmul.f32 %v5917_v0, %v1805_v22  ;;  %v1834_v40 = vadd.f32 %v1825_v21, %v1814_v14  ;;  %v1835_v33 = vadd.f32 %v1825_v21, %v1815_v1  ;;  %v4939_v1 = vld [vmem:[%s6874_s5 + $0x8] sm:$0xff]  }
 0x21a   :  { %1905 = vst.msk [vmem:[#allocation2 + $0x61] sm:$0xff] %vm1701_vm2, %v1847_v45  ;;  %1906 = vst.msk [vmem:[#allocation2 + $0x71] sm:$0xff] %vm1701_vm2, %v1848_v56  ;;  %v1836_v4 = vadd.f32 %v1825_v21, %v1816_v46  ;;  %v1821_v5 = vmul.f32 %v5980_v51, %v1805_v22  ;;  %v1837_v11 = vadd.f32 %v1825_v21, %v1817_v2  ;;  %v2025_v22 = vrot.slane %v5874_v35, 1 }
 0x21b   :  { %v1838_v13 = vadd.f32 %v1825_v21, %v1818_v3  ;;  %v1840_v57 = vadd.f32 %v1825_v21, %v1820_v28  ;;  %v1833_v48 = vadd.f32 %v1825_v21, %v1813_v23  ;;  %v1850_v42 = vmax.f32 %v1834_v40, 0.0 }
 0x21c   :  { %v1851_v6 = vmax.f32 %v1835_v33, 0.0  ;;  %v1852_v15 = vmax.f32 %v1836_v4, 0.0  ;;  %v1841_v32 = vadd.f32 %v1825_v21, %v1821_v5  ;;  %v1853_v47 = vmax.f32 %v1837_v11, 0.0 }
 0x21d   :  { %v1854_v31 = vmax.f32 %v1838_v13, 0.0  ;;  %v1856_v7 = vmax.f32 %v1840_v57, 0.0  ;;  %v1849_v53 = vmax.f32 %v1833_v48, 0.0  ;;  %1908 = vst.msk [vmem:[#allocation2 + $0xb1] sm:$0xff] %vm1701_vm2, %v1850_v42  ;;  %v2002_v36 = vsel %vm450_vm1, %v2000_v62, %v2001_v63 }
 0x21e   :  { %1909 = vst.msk [vmem:[#allocation2 + $0xc1] sm:$0xff] %vm1701_vm2, %v1851_v6  ;;  %1910 = vst.msk [vmem:[#allocation2 + $0xd1] sm:$0xff] %vm1701_vm2, %v1852_v15  ;;  %v1857_v0 = vmax.f32 %v1841_v32, 0.0  ;;  %v6035_v51 = vld [vmem:[#allocation2 + $0x10] sm:$0xff]  ;;  %v6037_v20 = vld [vmem:[#allocation2 + $0x18] sm:$0x3]  ;;  %v2026_v15 = vsel %vm450_vm1, %v2024_v61, %v2025_v22 }
 0x21f   :  { %v6039_v55 = vld [vmem:[#allocation2 + $0x20] sm:$0xff]  ;;  %1911 = vst.msk [vmem:[#allocation2 + $0xe1] sm:$0xff] %vm1701_vm2, %v1853_v47  ;;  %1912 = vst.msk [vmem:[#allocation2 + $0xf1] sm:$0xff] %vm1701_vm2, %v1854_v31  ;;  %v2003_v21 = vrot.slane %v6035_v51, 1  ;;  %v2004_v49 = vrot.slane %v6037_v20, 1  ;;  %v6056_v35 = vld [vmem:[#allocation2 + $0x30] sm:$0xff] }
 0x220   :  { %1914 = vst.msk [vmem:[#allocation2 + $0x111] sm:$0xff] %vm1701_vm2, %v1856_v7  ;;  %1907 = vst.msk [vmem:[#allocation2 + $0x81] sm:$0xff] %vm1701_vm2, %v1849_v53  ;;  %v6054_v10 = vld [vmem:[#allocation2 + $0x28] sm:$0x3]  ;;  %v2006_v9 = vrot.slane %v6039_v55, 1  ;;  %v2009_v18 = vrot.slane %v6056_v35, 1 }
 0x221   :  { %1915 = vst.msk [vmem:[#allocation2 + $0x121] sm:$0xff] %vm1701_vm2, %v1857_v0  ;;  %v6060_v30 = vld [vmem:[#allocation2 + $0x38] sm:$0x3]  ;;  %v2007_v39 = vrot.slane %v6054_v10, 1  ;;  %v6064_v54 = vld [vmem:[#allocation2 + $0x40] sm:$0xff]  ;;  %v6066_v62 = vld [vmem:[#allocation2 + $0x50] sm:$0xff]  ;;  %v6071_v59 = vsel %vm450_vm1, %v2003_v21, %v2004_v49 }
 0x222   :  { %v2010_v41 = vrot.slane %v6060_v30, 1  ;;  %v6074_v37 = vld [vmem:[#allocation2 + $0x48] sm:$0x3]  ;;  %v6076_v60 = vld [vmem:[#allocation2 + $0x58] sm:$0x3]  ;;  %v2012_v38 = vrot.slane %v6064_v54, 1  ;;  %v2064_v34 = vpack.c.bf16 %v6071_v59, %v2002_v36 }
 0x223   :  { %v6081_v43 = vsel %vm450_vm1, %v2006_v9, %v2007_v39  ;;  %v2013_v27 = vrot.slane %v6074_v37, 1  ;;  %v2015_v58 = vrot.slane %v6066_v62, 1  ;;  %v6085_v29 = vld [vmem:[#allocation2 + $0x60] sm:$0xff]  ;;  %v6087_v44 = vld [vmem:[#allocation2 + $0x68] sm:$0x3]  ;;  %v6089_v19 = vld [vmem:[#allocation2 + $0x70] sm:$0xff] }
 0x224   :  { %v6092_v26 = vsel %vm450_vm1, %v2009_v18, %v2010_v41  ;;  %v2016_v17 = vrot.slane %v6076_v60, 1  ;;  %v6095_v45 = vld [vmem:[#allocation2 + $0x78] sm:$0x3]  ;;  %v2018_v56 = vrot.slane %v6085_v29, 1  ;;  %v2019_v14 = vrot.slane %v6087_v44, 1  ;;  %4471 = vmatprep.mubr.msk.bf16.mxu1 %vm1701_vm2, %v2064_v34  ;;  %v6112_v23 = vld [vmem:[#allocation2 + $0xb0] sm:$0xff] }
 0x225   :  { %v6105_v46 = vpack.c.bf16 %v6092_v26, %v6081_v43  ;;  %v6108_v2 = vsel %vm450_vm1, %v2012_v38, %v2013_v27  ;;  %v2021_v3 = vrot.slane %v6089_v19, 1  ;;  %v2022_v28 = vrot.slane %v6095_v45, 1  ;;  %v6114_v40 = vld [vmem:[#allocation2 + $0xb8] sm:$0x3]  ;;  %v6116_v33 = vld [vmem:[#allocation2 + $0xc0] sm:$0xff]  ;;  %v6126_v57 = vld [vmem:[#allocation2 + $0xd0] sm:$0xff] }
 0x226   :  { %v6119_v4 = vsel %vm450_vm1, %v2015_v58, %v2016_v17  ;;  %v2027_v11 = vrot.slane %v6112_v23, 1  ;;  %v6124_v13 = vld [vmem:[#allocation2 + $0xc8] sm:$0x3]  ;;  %v6128_v48 = vld [vmem:[#allocation2 + $0xd8] sm:$0x3]  ;;  %v6130_v42 = vld [vmem:[#allocation2 + $0x100] sm:$0xff]  ;;  %v6156_v61 = vsel %vm450_vm1, %v2018_v56, %v2019_v14 }
 0x227   :  { %6952 = vst [vmem:[#allocation9_spill] sm:$0xff] %v6105_v46  ;;  %4472 = vmatmul.mubr.msk.bf16.vlgmr.msra.gmra.mrb[8].mxu1 %vm1701_vm2, %v6105_v46  ;;  %v6136_v6 = vpack.c.bf16 %v6119_v4, %v6108_v2  ;;  %v2028_v32 = vrot.slane %v6114_v40, 1  ;;  %v6140_v47 = vld [vmem:[#allocation2 + $0xe0] sm:$0xff]  ;;  %v6142_v31 = vld [vmem:[#allocation2 + $0xe8] sm:$0x3]  ;;  %v6144_v7 = vld [vmem:[#allocation2 + $0xf0] sm:$0xff]  ;;  %v6159_v22 = vsel %vm450_vm1, %v2021_v3, %v2022_v28 }
 0x228   :  { %4488 = vmatpush3.bf16.msra.mxu1 %v5869_v24  ;;  %v2030_v53 = vrot.slane %v6116_v33, 1  ;;  %v2031_v0 = vrot.slane %v6124_v13, 1  ;;  %v2033_v36 = vrot.slane %v6126_v57, 1  ;;  %v2034_v21 = vrot.slane %v6128_v48, 1  ;;  %v6151_v49 = vld [vmem:[#allocation2 + $0xf8] sm:$0x3] }
 0x229   :  { %6953 = vst [vmem:[#allocation7_spill] sm:$0xff] %v6136_v6  ;;  %4475 = vmatprep.mubr.msk.bf16.mxu1 %vm1701_vm2, %v6136_v6  ;;  %v6162_v24 = vsel %vm450_vm1, %v2027_v11, %v2028_v32  ;;  %4489 = vmatprep.subr.bf16.mxu1 %v4939_v1  ;;  %v6164_v9 = vld [vmem:[#allocation2 + $0x108] sm:$0x3]  ;;  %v6166_v39 = vld [vmem:[#allocation2 + $0x110] sm:$0xff]  ;;  %v6171_v18 = vld [vmem:[%s6874_s5 + $0x20] sm:$0xff]   ;;  %v2036_v41 = vrot.slane %v6140_v47, 1  ;;  %v6191_v32 = vpack.c.bf16 %v6159_v22, %v6156_v61 }
 0x22a   :  { %v2037_v38 = vrot.slane %v6142_v31, 1  ;;  %v2039_v34 = vrot.slane %v6144_v7, 1  ;;  %v2040_v27 = vrot.slane %v6151_v49, 1  ;;  %v6177_v58 = vld [vmem:[#allocation2 + $0x118] sm:$0x3]  ;;  %v2042_v17 = vrot.slane %v6130_v42, 1 }
 0x22b   :  { %v2043_v56 = vrot.slane %v6164_v9, 1  ;;  %v6182_v14 = vsel %vm450_vm1, %v2030_v53, %v2031_v0  ;;  %v6185_v3 = vsel %vm450_vm1, %v2033_v36, %v2034_v21  ;;  %v2045_v28 = vrot.slane %v6166_v39, 1  ;;  %6954 = vst [vmem:[#allocation6_spill] sm:$0xff] %v6191_v32 }
 0x22c   :  { %4490 = vmatpush3.bf16.msra.mxu1 %v4939_v1  ;;  %v2046_v11 = vrot.slane %v6177_v58, 1  ;;  %v2068_v5 = vpack.c.bf16 %v6162_v24, %v2026_v15  ;;  %v6196_v63 = vsel %vm450_vm1, %v2036_v41, %v2037_v38  ;;  %v6199_v53 = vsel %vm450_vm1, %v2039_v34, %v2040_v27 }
 0x22d   :  { %4507 = vmatprep.subr.bf16.mxu1 %v6171_v18  ;;  %v6202_v1 = vsel %vm450_vm1, %v2042_v17, %v2043_v56  ;;  %v6211_v15 = vpack.c.bf16 %v6185_v3, %v6182_v14  ;;  %v2350_v36 = vrot.slane %v6039_v55, 2  ;;  %v2351_v21 = vrot.slane %v6054_v10, 2 }
 0x22e   :  { %v6205_v0 = vsel %vm450_vm1, %v2045_v28, %v2046_v11  ;;  %v2353_v41 = vrot.slane %v6056_v35, 2  ;;  %v2354_v38 = vrot.slane %v6060_v30, 2  ;;  %v2356_v34 = vrot.slane %v6064_v54, 2 }
 0x22f   :  { %6955 = vst [vmem:[#allocation10_spill] sm:$0xff] %v6205_v0  ;;  %4476 = vmatmul.mubr.msk.bf16.gmra.mrb[12].mxu1 %vm1701_vm2, %v6191_v32  ;;  %6956 = vst [vmem:[#allocation11_spill] sm:$0xff] %v6211_v15  ;;  %v2357_v27 = vrot.slane %v6074_v37, 2  ;;  %v6222_v17 = vpack.c.bf16 %v6199_v53, %v6196_v63  ;;  %v6226_v56 = vpack.c.bf16 %v6205_v0, %v6202_v1  ;;  %v2347_v10 = vrot.slane %v6035_v51, 2 }
 0x230   :  { %4479 = vmatprep.mubr.msk.bf16.mxu1 %vm1701_vm2, %v2068_v5  ;;  %v6230_v5 = vsel %vm2343_vm4, %v2350_v36, %v2351_v21  ;;  %v2348_v28 = vrot.slane %v6037_v20, 2  ;;  %v6234_v30 = vsel %vm2343_vm4, %v2353_v41, %v2354_v38  ;;  %v2362_v11 = vrot.slane %v6085_v29, 2 }
 0x231   :  { %v6237_v37 = vsel %vm2343_vm4, %v2356_v34, %v2357_v27  ;;  %v6242_v50 = vpack.c.bf16 %v6234_v30, %v6230_v5  ;;  %v2359_v32 = vrot.slane %v6066_v62, 2  ;;  %v2363_v21 = vrot.slane %v6087_v44, 2 }
 0x232   :  { %v2360_v20 = vrot.slane %v6076_v60, 2  ;;  %v2365_v41 = vrot.slane %v6089_v19, 2  ;;  %v2366_v38 = vrot.slane %v6095_v45, 2  ;;  %v2371_v34 = vrot.slane %v6112_v23, 2 }
 0x233   :  { %v6253_v27 = vsel %vm2343_vm4, %v2362_v11, %v2363_v21  ;;  %v2372_v6 = vrot.slane %v6114_v40, 2  ;;  %v2374_v46 = vrot.slane %v6116_v33, 2  ;;  %v2375_v0 = vrot.slane %v6124_v13, 2 }
 0x234   :  { %v6259_v36 = vsel %vm2343_vm4, %v2365_v41, %v2366_v38  ;;  %v2377_v60 = vrot.slane %v6126_v57, 2  ;;  %v2378_v44 = vrot.slane %v6128_v48, 2  ;;  %v2380_v45 = vrot.slane %v6140_v47, 2 }
 0x235   :  { %v6268_v11 = vpack.c.bf16 %v6259_v36, %v6253_v27  ;;  %v6271_v40 = vsel %vm2343_vm4, %v2371_v34, %v2372_v6  ;;  %v6274_v13 = vsel %vm2343_vm4, %v2374_v46, %v2375_v0  ;;  %v2381_v21 = vrot.slane %v6142_v31, 2 }
 0x236   :  { %v6282_v41 = vsel %vm2343_vm4, %v2377_v60, %v2378_v44  ;;  %v2383_v38 = vrot.slane %v6144_v7, 2  ;;  %v2386_v31 = vrot.slane %v6130_v42, 2  ;;  %v2387_v0 = vrot.slane %v6164_v9, 2 }
 0x237   :  { %4480 = vmatmul.mubr.msk.bf16.gmra.mrb[16].mxu1 %vm1701_vm2, %v6211_v15  ;;  %v2384_v15 = vrot.slane %v6151_v49, 2  ;;  %v6288_v6 = vpack.c.bf16 %v6282_v41, %v6274_v13  ;;  %v6291_v46 = vsel %vm2343_vm4, %v2380_v45, %v2381_v21  ;;  %v2389_v60 = vrot.slane %v6166_v39, 2 }
 0x238   :  { %4483 = vmatprep.mubr.msk.bf16.mxu1 %vm1701_vm2, %v6222_v17  ;;  %v2390_v44 = vrot.slane %v6177_v58, 2  ;;  %v6303_v48 = vsel %vm2343_vm4, %v2347_v10, %v2348_v28  ;;  %v6310_v21 = vsel %vm2343_vm4, %v2386_v31, %v2387_v0  ;;  %v4942_v28 = vld [vmem:[%s6874_s5 + $0x30] sm:$0xff]   ;;  %v1960_v10 = vpack.c.bf16 %v6112_v23, %v5872_v25 }
 0x239   :  { %v6296_v34 = vsel %vm2343_vm4, %v2383_v38, %v2384_v15  ;;  %v6324_v38 = vsel %vm2343_vm4, %v2359_v32, %v2360_v20  ;;  %v6357_v20 = vpack.c.bf16 %v6056_v35, %v6039_v55  ;;  %v6376_v32 = vpack.c.bf16 %v6089_v19, %v6085_v29 }
 0x23a   :  { %v6307_v45 = vpack.c.bf16 %v6296_v34, %v6291_v46  ;;  %v6315_v15 = vsel %vm2343_vm4, %v2389_v60, %v2390_v44  ;;  %v1956_v44 = vpack.c.bf16 %v6035_v51, %v6001_v52  ;;  %v6364_v60 = vpack.c.bf16 %v6066_v62, %v6064_v54 }
 0x23b   :  { %v6328_v31 = vpack.c.bf16 %v6315_v15, %v6310_v21  ;;  %v2344_v0 = vrot.slane %v6001_v52, 2  ;;  %v2345_v25 = vrot.slane %v6003_v8, 2  ;;  %v6403_v9 = vpack.c.bf16 %v6166_v39, %v6130_v42  ;;  %v6957_v52 = vld [vmem:[#allocation19_spill] sm:$0xff]  ;;  %v6958_v8 = vld [vmem:[#allocation20_spill] sm:$0xff] }
 0x23d   :  { %v2346_v58 = vsel %vm2343_vm4, %v2344_v0, %v2345_v25  ;;  %v4943_v0 = vld [vmem:[%s6874_s5 + $0x38] sm:$0xff]   ;;  %v6418_v25 = vpack.c.bf16 %v6324_v38, %v6237_v37 }
 0x23e   :  { %v2408_v49 = vpack.c.bf16 %v6303_v48, %v2346_v58  ;;  %v6959_v58 = vld [vmem:[#allocation21_spill] sm:$0xff] }
 0x23f   :  { %4484 = vmatmul.mubr.msk.bf16.gmra.mrb[20].mxu1 %vm1701_vm2, %v6226_v56 }
 0x240   :  { %4491 = vmatprep.mubr.msk.bf16.mxu1 %vm1701_vm2, %v1956_v44  ;;  %v4941_v44 = vld [vmem:[%s6874_s5 + $0x28] sm:$0xff]  }
 0x247   :  { %4492 = vmatmul.mubr.msk.bf16.vlgmr.msra.gmra.mrb[8].mxu1 %vm1701_vm2, %v6357_v20 }
 0x248   :  { %4495 = vmatprep.mubr.msk.bf16.mxu1 %vm1701_vm2, %v6364_v60  ;;  %4508 = vmatpush3.bf16.msra.mxu1 %v6171_v18  ;;  %v6385_v18 = vpack.c.bf16 %v6126_v57, %v6116_v33 }
 0x249   :  { %4509 = vmatprep.subr.bf16.mxu1 %v4941_v44 }
 0x24c   :  { %4510 = vmatpush3.bf16.msra.mxu1 %v4941_v44  ;;  %v6389_v44 = vpack.c.bf16 %v6144_v7, %v6140_v47 }
 0x24d   :  { %4527 = vmatprep.subr.bf16.mxu1 %v4942_v28 }
 0x24f   :  { %4496 = vmatmul.mubr.msk.bf16.gmra.mrb[12].mxu1 %vm1701_vm2, %v6376_v32 }
 0x250   :  { %4499 = vmatprep.mubr.msk.bf16.mxu1 %vm1701_vm2, %v1960_v10  ;;  %v4950_v10 = vld [vmem:[%s6877_s8] sm:$0xff]  }
 0x251   :  { %4647 = vmatprep.subr.bf16.mxu0 %v4950_v10 }
 0x252   :  { %4648 = vmatpush3.bf16.msra.mxu0 %v4950_v10  ;;  %v6960_v10 = vld [vmem:[#allocation22_spill] sm:$0xff] }
 0x255   :  { %4650 = vmatmul.mubr.msk.bf16.vlgmr.msra.gmra.mrb[16].mxu0 %vm169_vm0, %v6957_v52  ;;  %v6961_v52 = vld [vmem:[#allocation23_spill] sm:$0xff] }
 0x256   :  { %4653 = vmatprep.mubr.msk.bf16.mxu0 %vm169_vm0, %v6958_v8  ;;  %v6962_v8 = vld [vmem:[#allocation24_spill] sm:$0xff] }
 0x257   :  { %4500 = vmatmul.mubr.msk.bf16.gmra.mrb[16].mxu1 %vm1701_vm2, %v6385_v18 }
 0x258   :  { %4503 = vmatprep.mubr.msk.bf16.mxu1 %vm1701_vm2, %v6389_v44 }
 0x25d   :  { %4654 = vmatmul.mubr.msk.bf16.gmra.mrb[20].mxu0 %vm169_vm0, %v6959_v58  ;;  %v6963_v58 = vpack.c.bf16 %v6271_v40, %v5879_v16  ;;  %v4945_v16 = vld [vmem:[%s6874_s5 + $0x48] sm:$0xff]  }
 0x25e   :  { %4657 = vmatprep.mubr.msk.bf16.mxu0 %vm169_vm0, %v6960_v10 }
 0x25f   :  { %4504 = vmatmul.mubr.msk.bf16.gmra.mrb[20].mxu1 %vm1701_vm2, %v6403_v9 }
 0x260   :  { %4511 = vmatprep.mubr.msk.bf16.mxu1 %vm1701_vm2, %v2408_v49  ;;  %v4944_v49 = vld [vmem:[%s6874_s5 + $0x40] sm:$0xff]  }
 0x265   :  { %4658 = vmatmul.mubr.msk.bf16.gmra.mrb[24].mxu0 %vm169_vm0, %v6961_v52  ;;  %v6974_v52 = vpack.c.bf16 %v6196_v63, %v6185_v3  ;;  %v4949_v63 = vld [vmem:[%s6874_s5 + $0x68] sm:$0xff]  }
 0x266   :  { %4661 = vmatprep.mubr.msk.bf16.mxu0 %vm169_vm0, %v6962_v8 }
 0x267   :  { %4512 = vmatmul.mubr.msk.bf16.vlgmr.msra.gmra.mrb[8].mxu1 %vm1701_vm2, %v6242_v50 }
 0x268   :  { %4515 = vmatprep.mubr.msk.bf16.mxu1 %vm1701_vm2, %v6418_v25  ;;  %4528 = vmatpush3.bf16.msra.mxu1 %v4942_v28  ;;  %v6964_v28 = vpack.c.bf16 %v6039_v55, %v6035_v51  ;;  %v4946_v51 = vld [vmem:[%s6874_s5 + $0x50] sm:$0xff]   ;;  %v6467_v55 = vld [vmem:[#allocation2 + $0x80] sm:$0xff] }
 0x269   :  { %4529 = vmatprep.subr.bf16.mxu1 %v4943_v0  ;;  %v2573_v10 = vpack.c.bf16 %v6467_v55, %v6089_v19  ;;  %v2906_v3 = vrot.slane %v6467_v55, 2 }
 0x26c   :  { %4530 = vmatpush3.bf16.msra.mxu1 %v4943_v0  ;;  %v6966_v0 = vpack.c.bf16 %v6085_v29, %v6066_v62  ;;  %v6969_v62 = vpack.c.bf16 %v6130_v42, %v6144_v7  ;;  %v6484_v29 = vld [vmem:[#allocation2 + $0x120] sm:$0xff]  ;;  %v2736_v42 = vrot.slane %v6467_v55, 1  ;;  %v6971_v7 = vpack.c.bf16 %v6108_v2, %v6092_v26 }
 0x26d   :  { %4547 = vmatprep.subr.bf16.mxu1 %v4944_v49  ;;  %4662 = vmatmul.mubr.msk.bf16.gmra.mrb[28].mxu0 %vm169_vm0, %v5627_v12  ;;  %v6965_v12 = vpack.c.bf16 %v6064_v54, %v6056_v35  ;;  %v6967_v35 = vpack.c.bf16 %v6116_v33, %v6112_v23  ;;  %v6968_v54 = vpack.c.bf16 %v6140_v47, %v6126_v57  ;;  %v1933_v33 = vld [vmem:[#allocation2 + $0x88] sm:$0x3]  ;;  %v4947_v57 = vld [vmem:[%s6874_s5 + $0x58] sm:$0xff]  }
 0x26e   :  { %v2577_v19 = vpack.c.bf16 %v6484_v29, %v6166_v39  ;;  %v6970_v23 = vpack.c.bf16 %v6081_v43, %v6071_v59  ;;  %v2737_v47 = vrot.slane %v1933_v33, 1  ;;  %v6972_v39 = vpack.c.bf16 %v6156_v61, %v6119_v4  ;;  %v4948_v59 = vld [vmem:[%s6874_s5 + $0x60] sm:$0xff]   ;;  %v1953_v4 = vld [vmem:[#allocation2 + $0x128] sm:$0x3] }
 0x26f   :  { %4516 = vmatmul.mubr.msk.bf16.gmra.mrb[12].mxu1 %vm1701_vm2, %v6268_v11  ;;  %v6973_v2 = vpack.c.bf16 %v6182_v14, %v6162_v24  ;;  %v2739_v61 = vrot.slane %v6484_v29, 1  ;;  %v6976_v24 = vld [vmem:[#allocation10_spill] sm:$0xff] }
 0x270   :  { %4519 = vmatprep.mubr.msk.bf16.mxu1 %vm1701_vm2, %v6963_v58  ;;  %v6509_v43 = vsel %vm450_vm1, %v2736_v42, %v2737_v47  ;;  %v6977_v58 = vpack.c.bf16 %v6230_v5, %v6303_v48  ;;  %v4951_v5 = vld [vmem:[%s6874_s5 + $0x70] sm:$0xff]  }
 0x271   :  { %v2747_v26 = vpack.c.bf16 %v6509_v43, %v6159_v22  ;;  %v6975_v22 = vpack.c.bf16 %v6202_v1, %v6199_v53  ;;  %v2907_v53 = vrot.slane %v1933_v33, 2  ;;  %v6978_v1 = vpack.c.bf16 %v6237_v37, %v6234_v30 }
 0x272   :  { %v6980_v30 = vpack.c.bf16 %v6274_v13, %v6271_v40  ;;  %v2909_v37 = vrot.slane %v6484_v29, 2  ;;  %v4952_v13 = vld [vmem:[%s6874_s5 + $0x78] sm:$0xff]  }
 0x273   :  { %v2908_v48 = vsel %vm2343_vm4, %v2906_v3, %v2907_v53 }
 0x277   :  { %4520 = vmatmul.mubr.msk.bf16.gmra.mrb[16].mxu1 %vm1701_vm2, %v6288_v6 }
 0x278   :  { %4523 = vmatprep.mubr.msk.bf16.mxu1 %vm1701_vm2, %v6307_v45 }
 0x27f   :  { %4524 = vmatmul.mubr.msk.bf16.gmra.mrb[20].mxu1 %vm1701_vm2, %v6328_v31 }
 0x280   :  { %4531 = vmatprep.mubr.msk.bf16.mxu1 %vm1701_vm2, %v6964_v28  ;;  %v6979_v28 = vpack.c.bf16 %v6253_v27, %v6324_v38  ;;  %v2910_v27 = vrot.slane %v1953_v4, 2  ;;  %v6981_v38 = vpack.c.bf16 %v6291_v46, %v6282_v41  ;;  %v4953_v41 = vld [vmem:[%s6874_s5 + $0x80] sm:$0xff]   ;;  %v1934_v46 = vld [vmem:[#allocation2 + $0x90] sm:$0xff] }
 0x287   :  { %4532 = vmatmul.mubr.msk.bf16.vlgmr.msra.gmra.mrb[8].mxu1 %vm1701_vm2, %v6965_v12  ;;  %v6982_v12 = vpack.c.bf16 %v6310_v21, %v6296_v34  ;;  %v3076_v34 = vpack.c.bf16 %v1934_v46, %v6467_v55  ;;  %v1954_v21 = vld [vmem:[#allocation2 + $0x130] sm:$0xff] }
 0x288   :  { %4535 = vmatprep.mubr.msk.bf16.mxu1 %vm1701_vm2, %v6966_v0  ;;  %4548 = vmatpush3.bf16.msra.mxu1 %v4944_v49  ;;  %v2740_v49 = vrot.slane %v1953_v4, 1 }
 0x289   :  { %4549 = vmatprep.subr.bf16.mxu1 %v4945_v16 }
 0x28a   :  { %v6528_v8 = vsel %vm450_vm1, %v2739_v61, %v2740_v49 }
 0x28b   :  { %v2751_v14 = vpack.c.bf16 %v6528_v8, %v6976_v24 }
 0x28c   :  { %4550 = vmatpush3.bf16.msra.mxu1 %v4945_v16  ;;  %v2917_v16 = vpack.c.bf16 %v2908_v48, %v6259_v36  ;;  %v6569_v36 = vsel %vm2343_vm4, %v2909_v37, %v2910_v27 }
 0x28d   :  { %4567 = vmatprep.subr.bf16.mxu1 %v4946_v51  ;;  %v2921_v40 = vpack.c.bf16 %v6569_v36, %v6315_v15  ;;  %v3077_v15 = vpack.c.bf16 %v1954_v21, %v6484_v29 }
 0x28f   :  { %4536 = vmatmul.mubr.msk.bf16.gmra.mrb[12].mxu1 %vm1701_vm2, %v2573_v10  ;;  %v6986_v10 = vld [vmem:[#allocation11_spill] sm:$0xff] }
 0x290   :  { %4539 = vmatprep.mubr.msk.bf16.mxu1 %vm1701_vm2, %v6967_v35  ;;  %v1955_v35 = vld [vmem:[#allocation2 + $0x138] sm:$0x3] }
 0x297   :  { %4540 = vmatmul.mubr.msk.bf16.gmra.mrb[16].mxu1 %vm1701_vm2, %v6968_v54  ;;  %v3221_v54 = vrot.slane %v1954_v21, 1 }
 0x298   :  { %4543 = vmatprep.mubr.msk.bf16.mxu1 %vm1701_vm2, %v6969_v62  ;;  %v3222_v62 = vrot.slane %v1955_v35, 1 }
 0x29a   :  { %v3223_v29 = vsel %vm450_vm1, %v3221_v54, %v3222_v62 }
 0x29f   :  { %4544 = vmatmul.mubr.msk.bf16.gmra.mrb[20].mxu1 %vm1701_vm2, %v2577_v19  ;;  %v3227_v19 = vpack.c.bf16 %v3223_v29, %v6528_v8 }
 0x2a0   :  { %4551 = vmatprep.mubr.msk.bf16.mxu1 %vm1701_vm2, %v6970_v23  ;;  %v3364_v23 = vrot.slane %v1934_v46, 2 }
 0x2a7   :  { %4552 = vmatmul.mubr.msk.bf16.vlgmr.msra.gmra.mrb[8].mxu1 %vm1701_vm2, %v6971_v7 }
 0x2a8   :  { %4555 = vmatprep.mubr.msk.bf16.mxu1 %vm1701_vm2, %v6972_v39  ;;  %4568 = vmatpush3.bf16.msra.mxu1 %v4946_v51  ;;  %v6984_v51 = vld [vmem:[#allocation7_spill] sm:$0xff] }
 0x2a9   :  { %4569 = vmatprep.subr.bf16.mxu1 %v4947_v57 }
 0x2ac   :  { %4570 = vmatpush3.bf16.msra.mxu1 %v4947_v57 }
 0x2ad   :  { %4587 = vmatprep.subr.bf16.mxu1 %v4948_v59 }
 0x2af   :  { %4556 = vmatmul.mubr.msk.bf16.gmra.mrb[12].mxu1 %vm1701_vm2, %v2747_v26 }
 0x2b0   :  { %4559 = vmatprep.mubr.msk.bf16.mxu1 %vm1701_vm2, %v6973_v2 }
 0x2b7   :  { %4560 = vmatmul.mubr.msk.bf16.gmra.mrb[16].mxu1 %vm1701_vm2, %v6974_v52 }
 0x2b8   :  { %4563 = vmatprep.mubr.msk.bf16.mxu1 %vm1701_vm2, %v6975_v22 }
 0x2bf   :  { %4564 = vmatmul.mubr.msk.bf16.gmra.mrb[20].mxu1 %vm1701_vm2, %v2751_v14 }
 0x2c0   :  { %4571 = vmatprep.mubr.msk.bf16.mxu1 %vm1701_vm2, %v6977_v58 }
 0x2c7   :  { %4572 = vmatmul.mubr.msk.bf16.vlgmr.msra.gmra.mrb[8].mxu1 %vm1701_vm2, %v6978_v1 }
 0x2c8   :  { %4575 = vmatprep.mubr.msk.bf16.mxu1 %vm1701_vm2, %v6979_v28  ;;  %4588 = vmatpush3.bf16.msra.mxu1 %v4948_v59 }
 0x2c9   :  { %4589 = vmatprep.subr.bf16.mxu1 %v4949_v63 }
 0x2cc   :  { %4590 = vmatpush3.bf16.msra.mxu1 %v4949_v63 }
 0x2cd   :  { %4607 = vmatprep.subr.bf16.mxu1 %v4951_v5 }
 0x2cf   :  { %4576 = vmatmul.mubr.msk.bf16.gmra.mrb[12].mxu1 %vm1701_vm2, %v2917_v16 }
 0x2d0   :  { %4579 = vmatprep.mubr.msk.bf16.mxu1 %vm1701_vm2, %v6980_v30 }
 0x2d7   :  { %4580 = vmatmul.mubr.msk.bf16.gmra.mrb[16].mxu1 %vm1701_vm2, %v6981_v38 }
 0x2d8   :  { %4583 = vmatprep.mubr.msk.bf16.mxu1 %vm1701_vm2, %v6982_v12 }
 0x2df   :  { %4584 = vmatmul.mubr.msk.bf16.gmra.mrb[20].mxu1 %vm1701_vm2, %v2921_v40 }
 0x2e0   :  { %4591 = vmatprep.mubr.msk.bf16.mxu1 %vm1701_vm2, %v6357_v20  ;;  %v4954_v20 = vld [vmem:[%s6874_s5 + $0x88] sm:$0xff]  }
 0x2e7   :  { %4592 = vmatmul.mubr.msk.bf16.vlgmr.msra.gmra.mrb[8].mxu1 %vm1701_vm2, %v6364_v60  ;;  %v6983_v60 = vld [vmem:[#allocation9_spill] sm:$0xff] }
 0x2e8   :  { %4595 = vmatprep.mubr.msk.bf16.mxu1 %vm1701_vm2, %v6376_v32  ;;  %4608 = vmatpush3.bf16.msra.mxu1 %v4951_v5  ;;  %v1935_v32 = vld [vmem:[#allocation2 + $0x98] sm:$0x3] }
 0x2e9   :  { %4609 = vmatprep.subr.bf16.mxu1 %v4952_v13  ;;  %v3219_v0 = vrot.slane %v1935_v32, 1  ;;  %v3365_v33 = vrot.slane %v1935_v32, 2 }
 0x2ec   :  { %4610 = vmatpush3.bf16.msra.mxu1 %v4952_v13 }
 0x2ed   :  { %4627 = vmatprep.subr.bf16.mxu1 %v4953_v41 }
 0x2ef   :  { %4596 = vmatmul.mubr.msk.bf16.gmra.mrb[12].mxu1 %vm1701_vm2, %v3076_v34 }
 0x2f0   :  { %4599 = vmatprep.mubr.msk.bf16.mxu1 %vm1701_vm2, %v6385_v18  ;;  %v3218_v18 = vrot.slane %v1934_v46, 1 }
 0x2f7   :  { %4600 = vmatmul.mubr.msk.bf16.gmra.mrb[16].mxu1 %vm1701_vm2, %v6389_v44  ;;  %v6985_v44 = vld [vmem:[#allocation6_spill] sm:$0xff] }
 0x2f8   :  { %4603 = vmatprep.mubr.msk.bf16.mxu1 %vm1701_vm2, %v6403_v9  ;;  %v3220_v9 = vsel %vm450_vm1, %v3218_v18, %v3219_v0 }
 0x2f9   :  { %v3226_v55 = vpack.c.bf16 %v3220_v9, %v6509_v43 }
 0x2ff   :  { %4604 = vmatmul.mubr.msk.bf16.gmra.mrb[20].mxu1 %vm1701_vm2, %v3077_v15 }
 0x300   :  { %4611 = vmatprep.mubr.msk.bf16.mxu1 %vm1701_vm2, %v6983_v60 }
 0x307   :  { %4612 = vmatmul.mubr.msk.bf16.vlgmr.msra.gmra.mrb[8].mxu1 %vm1701_vm2, %v6984_v51 }
 0x308   :  { %4615 = vmatprep.mubr.msk.bf16.mxu1 %vm1701_vm2, %v6985_v44  ;;  %4628 = vmatpush3.bf16.msra.mxu1 %v4953_v41 }
 0x309   :  { %4629 = vmatprep.subr.bf16.mxu1 %v4954_v20 }
 0x30c   :  { %4630 = vmatpush3.bf16.msra.mxu1 %v4954_v20 }
 0x30f   :  { %4616 = vmatmul.mubr.msk.bf16.gmra.mrb[12].mxu1 %vm1701_vm2, %v3226_v55 }
 0x310   :  { %4619 = vmatprep.mubr.msk.bf16.mxu1 %vm1701_vm2, %v6986_v10 }
 0x317   :  { %4620 = vmatmul.mubr.msk.bf16.gmra.mrb[16].mxu1 %vm1701_vm2, %v6222_v17  ;;  %v3366_v17 = vsel %vm2343_vm4, %v3364_v23, %v3365_v33 }
 0x318   :  { %4623 = vmatprep.mubr.msk.bf16.mxu1 %vm1701_vm2, %v6226_v56  ;;  %v3372_v56 = vpack.c.bf16 %v3366_v17, %v2908_v48 }
 0x31f   :  { %4624 = vmatmul.mubr.msk.bf16.gmra.mrb[20].mxu1 %vm1701_vm2, %v3227_v19 }
 0x320   :  { %4631 = vmatprep.mubr.msk.bf16.mxu1 %vm1701_vm2, %v6242_v50 }
 0x327   :  { %4632 = vmatmul.mubr.msk.bf16.vlgmr.msra.gmra.mrb[8].mxu1 %vm1701_vm2, %v6418_v25  ;;  %v3367_v25 = vrot.slane %v1954_v21, 2 }
 0x328   :  { %4635 = vmatprep.mubr.msk.bf16.mxu1 %vm1701_vm2, %v6268_v11  ;;  %v6627_v57 = vpop.f32.mrb[16].mxu0  ;;  %v3368_v11 = vrot.slane %v1955_v35, 2 }
 0x329   :  { %v6629_v42 = vpop.f32.mrb[17].mxu0  ;;  %v3747_v39 = vmul.f32 %v6627_v57, %v6627_v57 }
 0x32a   :  { %v3745_v50 = vmul.f32 %v6629_v42, %v6629_v42  ;;  %v6633_v47 = vpop.f32.mrb[18].mxu0  ;;  %v3369_v4 = vsel %vm2343_vm4, %v3367_v25, %v3368_v11 }
 0x32b   :  { %v6635_v7 = vpop.f32.mrb[19].mxu0  ;;  %v3748_v43 = vmul.f32 %v6633_v47, %v6633_v47  ;;  %v3373_v58 = vpack.c.bf16 %v3369_v4, %v6569_v36 }
 0x32c   :  { %v3723_v59 = vadd.f32 %v6635_v7, %v6629_v42 }
 0x32e   :  { %v3724_v26 = vadd.f32 %v6627_v57, %v3723_v59 }
 0x32f   :  { %4636 = vmatmul.mubr.msk.bf16.gmra.mrb[12].mxu1 %vm1701_vm2, %v3372_v56 }
 0x330   :  { %4639 = vmatprep.mubr.msk.bf16.mxu1 %vm1701_vm2, %v6288_v6  ;;  %v3746_v6 = vmul.f32 %v6635_v7, %v6635_v7  ;;  %v6651_v49 = vpop.f32.mrb[20].mxu0  ;;  %v3725_v52 = vadd.f32 %v6633_v47, %v3724_v26 }
 0x331   :  { %v6654_v22 = vpop.f32.mrb[21].mxu0  ;;  %v3751_v63 = vmul.f32 %v6651_v49, %v6651_v49 }
 0x332   :  { %v3761_v2 = vadd.f32 %v3746_v6, %v3745_v50  ;;  %v3749_v8 = vmul.f32 %v6654_v22, %v6654_v22  ;;  %v6659_v14 = vpop.f32.mrb[22].mxu0 }
 0x333   :  { %v3752_v28 = vmul.f32 %v6659_v14, %v6659_v14 }
 0x334   :  { %v3762_v61 = vadd.f32 %v3761_v2, %v3747_v39 }
 0x336   :  { %v3763_v24 = vadd.f32 %v3762_v61, %v3748_v43 }
 0x337   :  { %4640 = vmatmul.mubr.msk.bf16.gmra.mrb[16].mxu1 %vm1701_vm2, %v6307_v45  ;;  %v3726_v45 = vadd.f32 %v3725_v52, %v6654_v22 }
 0x338   :  { %4643 = vmatprep.mubr.msk.bf16.mxu1 %vm1701_vm2, %v6328_v31  ;;  %v6662_v31 = vpop.f32.mrb[23].mxu0  ;;  %v3764_v3 = vadd.f32 %v3763_v24, %v3749_v8 }
 0x339   :  { %v3727_v53 = vadd.f32 %v3726_v45, %v6662_v31  ;;  %v3750_v1 = vmul.f32 %v6662_v31, %v6662_v31  ;;  %v6673_v30 = vpop.f32.mrb[24].mxu0 }
 0x33a   :  { %v6676_v27 = vpop.f32.mrb[25].mxu0  ;;  %v3755_v41 = vmul.f32 %v6673_v30, %v6673_v30 }
 0x33b   :  { %v3728_v5 = vadd.f32 %v6651_v49, %v3727_v53  ;;  %v3765_v48 = vadd.f32 %v3764_v3, %v3750_v1  ;;  %v3753_v12 = vmul.f32 %v6676_v27, %v6676_v27  ;;  %v6681_v40 = vpop.f32.mrb[26].mxu0  ;;  %v3787_v1 = vld [vmem:[%s6878_s9] sm:$0x1] }
 0x33c   :  { %v6683_v13 = vpop.f32.mrb[27].mxu0  ;;  %v3756_v15 = vmul.f32 %v6681_v40, %v6681_v40 }
 0x33d   :  { %v3766_v16 = vadd.f32 %v3765_v48, %v3751_v63  ;;  %v3729_v37 = vadd.f32 %v6659_v14, %v3728_v5  ;;  %v3754_v21 = vmul.f32 %v6683_v13, %v6683_v13 }
 0x33f   :  { %4644 = vmatmul.mubr.msk.bf16.gmra.mrb[20].mxu1 %vm1701_vm2, %v3373_v58  ;;  %v3730_v38 = vadd.f32 %v3729_v37, %v6676_v27  ;;  %v3767_v36 = vadd.f32 %v3766_v16, %v3752_v28  ;;  %v3791_v16 = vld [vmem:[%s6879_s10] sm:$0x1] }
 0x340   :  { %v6693_v18 = vpop.f32.mrb[28].mxu0 }
 0x341   :  { %v3768_v46 = vadd.f32 %v3767_v36, %v3753_v12  ;;  %v3731_v34 = vadd.f32 %v3730_v38, %v6683_v13  ;;  %v6696_v51 = vpop.f32.mrb[29].mxu0  ;;  %v3759_v54 = vmul.f32 %v6693_v18, %v6693_v18  ;;  %v6987_v38 = vld [vmem:[#allocation8_spill] sm:$0xff] }
 0x342   :  { %v3757_v9 = vmul.f32 %v6696_v51, %v6696_v51  ;;  %v6701_v10 = vpop.f32.mrb[30].mxu0 }
 0x343   :  { %v3732_v60 = vadd.f32 %v6673_v30, %v3731_v34  ;;  %v3769_v32 = vadd.f32 %v3768_v46, %v3754_v21  ;;  %v3711_v35 = vpop.f32.mrb[31].mxu0  ;;  %v3760_v23 = vmul.f32 %v6701_v10, %v6701_v10 }
 0x344   :  { %v3758_v19 = vmul.f32 %v3711_v35, %v3711_v35 }
 0x345   :  { %v3770_v20 = vadd.f32 %v3769_v32, %v3755_v41  ;;  %v3733_v0 = vadd.f32 %v6681_v40, %v3732_v60 }
 0x347   :  { %v3734_v44 = vadd.f32 %v3733_v0, %v6696_v51  ;;  %v3771_v55 = vadd.f32 %v3770_v20, %v3756_v15 }
 0x349   :  { %v3772_v62 = vadd.f32 %v3771_v55, %v3757_v9  ;;  %v3735_v29 = vadd.f32 %v3734_v44, %v3711_v35 }
 0x34b   :  { %v3736_v33 = vadd.f32 %v6693_v18, %v3735_v29  ;;  %v3773_v17 = vadd.f32 %v3772_v62, %v3758_v19 }
 0x34d   :  { %v3737_v56 = vadd.f32 %v6701_v10, %v3736_v33  ;;  %v3774_v50 = vadd.f32 %v3773_v17, %v3759_v54 }
 0x34f   :  { %v3738_v25 = vrot.slane %v3737_v56, 4  ;;  %v3775_v11 = vadd.f32 %v3774_v50, %v3760_v23 }
 0x351   :  { %v3739_v39 = vadd.f32 %v3738_v25, %v3737_v56  ;;  %v3776_v59 = vrot.slane %v3775_v11, 4 }
 0x353   :  { %v3740_v6 = vrot.slane %v3739_v39, 2  ;;  %v3777_v43 = vadd.f32 %v3776_v59, %v3775_v11 }
 0x355   :  { %v3741_v26 = vadd.f32 %v3740_v6, %v3739_v39  ;;  %v3778_v2 = vrot.slane %v3777_v43, 2 }
 0x357   :  { %v3742_v4 = vrot.slane %v3741_v26, 1  ;;  %v3779_v61 = vadd.f32 %v3778_v2, %v3777_v43 }
 0x359   :  { %v3743_v52 = vadd.f32 %v3742_v4, %v3741_v26  ;;  %v3780_v45 = vrot.slane %v3779_v61, 1 }
 0x35b   :  { %v3744_v8 = vmul.f32 0.0078125, %v3743_v52  ;;  %v3781_v24 = vadd.f32 %v3780_v45, %v3779_v61 }
 0x35d   :  { %v3782_v58 = vmul.f32 0.0078125, %v3781_v24  ;;  %v3783_v63 = vmul.f32 %v3744_v8, %v3744_v8  ;;  %v3789_v28 = vsub.f32 0.0, %v3744_v8 }
 0x35f   :  { %v3784_v3 = vsub.f32 %v3782_v58, %v3783_v63 }
 0x361   :  { %v3785_v53 = vadd.f32 1e-05, %v3784_v3 }
 0x363   :  { %4957 = vrsqrt.f32 %v3785_v53 }
 0x36d   :  { %v4958_v5 = vpop.eup %4957 }
 0x36e   :  { %v3788_v48 = vmul.f32 %v4958_v5, %v3787_v1 }
 0x370   :  { %v3790_v37 = vmul.f32 %v3789_v28, %v3788_v48  ;;  %v3796_v12 = vrot.slane %v3788_v48, %v6987_v38 }
 0x372   :  { %v3792_v36 = vadd.f32 %v3791_v16, %v3790_v37  ;;  %v3810_v41 = vmul.f32 %v3796_v12, %v3711_v35  ;;  %v3797_v21 = vmul.f32 %v3796_v12, %v6629_v42  ;;  %v3798_v15 = vmul.f32 %v3796_v12, %v6635_v7 }
 0x373   :  { %v3799_v60 = vmul.f32 %v6627_v57, %v3796_v12  ;;  %v3800_v32 = vmul.f32 %v6633_v47, %v3796_v12  ;;  %v3801_v55 = vmul.f32 %v3796_v12, %v6654_v22  ;;  %v3802_v35 = vmul.f32 %v3796_v12, %v6662_v31 }
 0x374   :  { %v3816_v46 = vrot.slane %v3792_v36, %v6987_v38  ;;  %v3803_v42 = vmul.f32 %v6651_v49, %v3796_v12  ;;  %v3804_v7 = vmul.f32 %v6659_v14, %v3796_v12  ;;  %v3805_v29 = vmul.f32 %v3796_v12, %v6676_v27 }
 0x375   :  { %v3806_v19 = vmul.f32 %v3796_v12, %v6683_v13  ;;  %v3807_v22 = vmul.f32 %v6673_v30, %v3796_v12  ;;  %v3808_v31 = vmul.f32 %v6681_v40, %v3796_v12  ;;  %v3809_v17 = vmul.f32 %v3796_v12, %v6696_v51 }
 0x376   :  { %v6717_v34 = vadd.f32 %v3816_v46, %v3810_v41  ;;  %v6723_v20 = vadd.f32 %v3816_v46, %v3797_v21  ;;  %v6725_v0 = vadd.f32 %v3816_v46, %v3798_v15  ;;  %v6727_v44 = vadd.f32 %v3816_v46, %v3799_v60 }
 0x377   :  { %v6729_v9 = vadd.f32 %v3816_v46, %v3800_v32  ;;  %v6735_v54 = vadd.f32 %v3816_v46, %v3801_v55  ;;  %v6737_v57 = vadd.f32 %v3816_v46, %v3802_v35  ;;  %v6739_v47 = vadd.f32 %v3816_v46, %v3803_v42 }
 0x378   :  { %v6741_v62 = vadd.f32 %v3816_v46, %v3804_v7  ;;  %v6747_v23 = vadd.f32 %v3816_v46, %v3805_v29  ;;  %v6749_v49 = vadd.f32 %v3816_v46, %v3806_v19  ;;  %v6751_v14 = vadd.f32 %v3816_v46, %v3807_v22 }
 0x379   :  { %v6753_v33 = vadd.f32 %v3816_v46, %v3808_v31  ;;  %v3811_v56 = vmul.f32 %v6693_v18, %v3796_v12  ;;  %v3812_v27 = vmul.f32 %v6701_v10, %v3796_v12  ;;  %v6758_v50 = vadd.f32 %v3816_v46, %v3809_v17 }
 0x37b   :  { %v6760_v13 = vadd.f32 %v3816_v46, %v3811_v56  ;;  %v6762_v30 = vadd.f32 %v3816_v46, %v3812_v27 }
 0x3fa   :  { %v6764_v40 = vpop.f32.mrb[8].mxu1 }
 0x3fb   :  { %v6766_v25 = vpop.f32.mrb[9].mxu1  ;;  %v3534_v59 = vmul.f32 %v6764_v40, %v6764_v40 }
 0x3fc   :  { %v6768_v11 = vpop.f32.mrb[10].mxu1  ;;  %v3532_v51 = vmul.f32 %v6766_v25, %v6766_v25 }
 0x3fd   :  { %v6770_v39 = vpop.f32.mrb[11].mxu1  ;;  %v3535_v26 = vmul.f32 %v6768_v11, %v6768_v11 }
 0x3fe   :  { %v3510_v18 = vadd.f32 %v6770_v39, %v6766_v25  ;;  %v3533_v10 = vmul.f32 %v6770_v39, %v6770_v39 }
 0x400   :  { %v3511_v6 = vadd.f32 %v6764_v40, %v3510_v18  ;;  %v3548_v43 = vadd.f32 %v3533_v10, %v3532_v51 }
 0x402   :  { %v3549_v2 = vadd.f32 %v3548_v43, %v3534_v59  ;;  %v6783_v4 = vpop.f32.mrb[12].mxu1  ;;  %v3512_v61 = vadd.f32 %v6768_v11, %v3511_v6 }
 0x403   :  { %v6786_v52 = vpop.f32.mrb[13].mxu1  ;;  %v3538_v28 = vmul.f32 %v6783_v4, %v6783_v4 }
 0x404   :  { %v3513_v45 = vadd.f32 %v3512_v61, %v6786_v52  ;;  %v3536_v8 = vmul.f32 %v6786_v52, %v6786_v52  ;;  %v3550_v24 = vadd.f32 %v3549_v2, %v3535_v26  ;;  %v6791_v58 = vpop.f32.mrb[14].mxu1 }
 0x405   :  { %v6793_v63 = vpop.f32.mrb[15].mxu1  ;;  %v3539_v16 = vmul.f32 %v6791_v58, %v6791_v58 }
 0x406   :  { %v3551_v3 = vadd.f32 %v3550_v24, %v3536_v8  ;;  %v3514_v53 = vadd.f32 %v3513_v45, %v6793_v63  ;;  %v3537_v1 = vmul.f32 %v6793_v63, %v6793_v63 }
 0x408   :  { %v3515_v5 = vadd.f32 %v6783_v4, %v3514_v53  ;;  %v3552_v48 = vadd.f32 %v3551_v3, %v3537_v1 }
 0x40a   :  { %v3553_v37 = vadd.f32 %v3552_v48, %v3538_v28  ;;  %v6803_v12 = vpop.f32.mrb[16].mxu1  ;;  %v3516_v36 = vadd.f32 %v6791_v58, %v3515_v5 }
 0x40b   :  { %v6806_v41 = vpop.f32.mrb[17].mxu1  ;;  %v3542_v7 = vmul.f32 %v6803_v12, %v6803_v12 }
 0x40c   :  { %v3517_v46 = vadd.f32 %v3516_v36, %v6806_v41  ;;  %v3540_v21 = vmul.f32 %v6806_v41, %v6806_v41  ;;  %v3554_v15 = vadd.f32 %v3553_v37, %v3539_v16  ;;  %v6811_v60 = vpop.f32.mrb[18].mxu1 }
 0x40d   :  { %v6813_v32 = vpop.f32.mrb[19].mxu1  ;;  %v3543_v22 = vmul.f32 %v6811_v60, %v6811_v60 }
 0x40e   :  { %v3555_v55 = vadd.f32 %v3554_v15, %v3540_v21  ;;  %v3518_v35 = vadd.f32 %v3517_v46, %v6813_v32  ;;  %v3541_v42 = vmul.f32 %v6813_v32, %v6813_v32 }
 0x410   :  { %v3519_v29 = vadd.f32 %v6803_v12, %v3518_v35  ;;  %v3556_v19 = vadd.f32 %v3555_v55, %v3541_v42 }
 0x412   :  { %v3557_v31 = vadd.f32 %v3556_v19, %v3542_v7  ;;  %v4645_v17 = vpop.f32.mrb[20].mxu1  ;;  %v3520_v56 = vadd.f32 %v6811_v60, %v3519_v29 }
 0x413   :  { %v3479_v27 = vpop.f32.mrb[21].mxu1  ;;  %v3546_v61 = vmul.f32 %v4645_v17, %v4645_v17 }
 0x414   :  { %v3521_v51 = vadd.f32 %v3520_v56, %v3479_v27  ;;  %v3544_v18 = vmul.f32 %v3479_v27, %v3479_v27  ;;  %v3558_v10 = vadd.f32 %v3557_v31, %v3543_v22  ;;  %v4646_v59 = vpop.f32.mrb[22].mxu1  ;;  %v3574_v56 = vld [vmem:[%s6876_s7] sm:$0x1]  ;;  %s4986_s7 = smov [#allocation3]  }
 0x415   :  { %v3482_v6 = vpop.f32.mrb[23].mxu1  ;;  %v3547_v24 = vmul.f32 %v4646_v59, %v4646_v59  ;;  %s3886_s18 = sshll.u32 %s4986_s7, 4  ;;  %s3887_s18 = int_to_ptr.vmem [resolvable:$true] %s3886_s18 }
 0x416   :  { %v3559_v43 = vadd.f32 %v3558_v10, %v3544_v18  ;;  %v3522_v26 = vadd.f32 %v3521_v51, %v3482_v6  ;;  %v3545_v2 = vmul.f32 %v3482_v6, %v3482_v6  ;;  %s4961_s8 = scalar_lea.vmem %s3887_s18, 2048  ;;  %p4966_p1 = scmp.lt.s32.totalorder %s3887_s18, %s3887_s18 }
 0x417   :  { %p4962_p0 = scmp.ne.s32.totalorder %s3887_s18, %s4961_s8  ;;  %p4967_p2 = scmp.lt.s32.totalorder %s4961_s8, %s4961_s8 }
 0x418   :  { %v3523_v45 = vadd.f32 %v4645_v17, %v3522_v26  ;;  %v3560_v8 = vadd.f32 %v3559_v43, %v3545_v2 }
 0x419   :  { %p4968_p3 = por %p4967_p2, %p4966_p1 }
 0x41a   :  { %v3524_v3 = vadd.f32 %v4646_v59, %v3523_v45  ;;  %v3561_v53 = vadd.f32 %v3560_v8, %v3546_v61 }
 0x41b   :  { %p4969_p4 = pnand %p4968_p3, %p4962_p0 }
 0x41c   :  { %v3525_v1 = vrot.slane %v3524_v3, 4  ;;  %v3562_v28 = vadd.f32 %v3561_v53, %v3547_v24 }
 0x41e   :  { %v3526_v5 = vadd.f32 %v3525_v1, %v3524_v3  ;;  %v3563_v48 = vrot.slane %v3562_v28, 4 }
 0x420   :  { %v3527_v16 = vrot.slane %v3526_v5, 2  ;;  %v3564_v37 = vadd.f32 %v3563_v48, %v3562_v28 }
 0x422   :  { %v3528_v36 = vadd.f32 %v3527_v16, %v3526_v5  ;;  %v3565_v46 = vrot.slane %v3564_v37, 2 }
 0x424   :  { %v3529_v21 = vrot.slane %v3528_v36, 1  ;;  %v3566_v15 = vadd.f32 %v3565_v46, %v3564_v37 }
 0x426   :  { %v3530_v55 = vadd.f32 %v3529_v21, %v3528_v36  ;;  %v3567_v35 = vrot.slane %v3566_v15, 1 }
 0x428   :  { %v3531_v42 = vmul.f32 0.0078125, %v3530_v55  ;;  %v3568_v7 = vadd.f32 %v3567_v35, %v3566_v15 }
 0x42a   :  { %v3569_v29 = vmul.f32 0.0078125, %v3568_v7  ;;  %v3570_v19 = vmul.f32 %v3531_v42, %v3531_v42  ;;  %v3576_v10 = vsub.f32 0.0, %v3531_v42 }
 0x42c   :  { %v3571_v22 = vsub.f32 %v3569_v29, %v3570_v19 }
 0x42e   :  { %v3572_v31 = vadd.f32 1e-05, %v3571_v22 }
 0x430   :  { %4959 = vrsqrt.f32 %v3572_v31 }
 0x43a   :  { %v4960_v51 = vpop.eup %4959 }
 0x43b   :  { %v3575_v18 = vmul.f32 %v4960_v51, %v3574_v56 }
 0x43d   :  { %v3577_v43 = vmul.f32 %v3576_v10, %v3575_v18  ;;  %v3581_v26 = vrot.slane %v3575_v18, %v6987_v38 }
 0x43f   :  { %v3595_v2 = vmul.f32 %v3581_v26, %v3482_v6  ;;  %v3601_v61 = vrot.slane %v3577_v43, %v6987_v38  ;;  %v3582_v45 = vmul.f32 %v3581_v26, %v6766_v25  ;;  %v3583_v8 = vmul.f32 %v3581_v26, %v6770_v39 }
 0x440   :  { %v3584_v24 = vmul.f32 %v6764_v40, %v3581_v26  ;;  %v3585_v3 = vmul.f32 %v6768_v11, %v3581_v26  ;;  %v3586_v53 = vmul.f32 %v3581_v26, %v6786_v52  ;;  %v3587_v1 = vmul.f32 %v3581_v26, %v6793_v63 }
 0x441   :  { %v3615_v28 = vadd.f32 %v3601_v61, %v3595_v2  ;;  %v3588_v5 = vmul.f32 %v6783_v4, %v3581_v26  ;;  %v3589_v48 = vmul.f32 %v6791_v58, %v3581_v26  ;;  %v3590_v6 = vmul.f32 %v3581_v26, %v6806_v41 }
 0x442   :  { %v3591_v38 = vmul.f32 %v3581_v26, %v6813_v32  ;;  %v3592_v25 = vmul.f32 %v6803_v12, %v3581_v26  ;;  %v3593_v39 = vmul.f32 %v6811_v60, %v3581_v26  ;;  %v3594_v40 = vmul.f32 %v3581_v26, %v3479_v27 }
 0x443   :  { %v3846_v11 = vadd.f32 %v6717_v34, %v3615_v28  ;;  %v3596_v16 = vmul.f32 %v4645_v17, %v3581_v26  ;;  %v3597_v52 = vmul.f32 %v4646_v59, %v3581_v26  ;;  %v3602_v37 = vadd.f32 %v3601_v61, %v3582_v45 }
 0x444   :  { %v3603_v63 = vadd.f32 %v3601_v61, %v3583_v8  ;;  %v3604_v36 = vadd.f32 %v3601_v61, %v3584_v24  ;;  %v3605_v46 = vadd.f32 %v3601_v61, %v3585_v3  ;;  %v3606_v4 = vadd.f32 %v3601_v61, %v3586_v53 }
 0x445   :  { %v3862_v21 = vmax.f32 %v3846_v11, 0.0  ;;  %v3607_v58 = vadd.f32 %v3601_v61, %v3587_v1  ;;  %v3608_v15 = vadd.f32 %v3601_v61, %v3588_v5  ;;  %v3609_v41 = vadd.f32 %v3601_v61, %v3589_v48 }
 0x446   :  { %v3610_v55 = vadd.f32 %v3601_v61, %v3590_v6  ;;  %v3611_v32 = vadd.f32 %v3601_v61, %v3591_v38  ;;  %v3612_v35 = vadd.f32 %v3601_v61, %v3592_v25  ;;  %v3613_v12 = vadd.f32 %v3601_v61, %v3593_v39 }
 0x447   :  { %3878 = vst [vmem:[#allocation3 + $0x68] sm:$0xff] %v3862_v21  ;;  %v3614_v60 = vadd.f32 %v3601_v61, %v3594_v40  ;;  %v3616_v27 = vadd.f32 %v3601_v61, %v3596_v16  ;;  %v3617_v42 = vadd.f32 %v3601_v61, %v3597_v52  ;;  %v3833_v34 = vadd.f32 %v6723_v20, %v3602_v37 }
 0x448   :  { %v3834_v17 = vadd.f32 %v6725_v0, %v3603_v63  ;;  %v3835_v59 = vadd.f32 %v6727_v44, %v3604_v36  ;;  %v3836_v7 = vadd.f32 %v6729_v9, %v3605_v46  ;;  %v3837_v29 = vadd.f32 %v6735_v54, %v3606_v4 }
 0x449   :  { %v3838_v19 = vadd.f32 %v6737_v57, %v3607_v58  ;;  %v3839_v22 = vadd.f32 %v6739_v47, %v3608_v15  ;;  %v3840_v31 = vadd.f32 %v6741_v62, %v3609_v41  ;;  %v3841_v56 = vadd.f32 %v6747_v23, %v3610_v55 }
 0x44a   :  { %v3842_v51 = vadd.f32 %v6749_v49, %v3611_v32  ;;  %v3843_v20 = vadd.f32 %v6751_v14, %v3612_v35  ;;  %v3844_v0 = vadd.f32 %v6753_v33, %v3613_v12  ;;  %v3845_v44 = vadd.f32 %v6758_v50, %v3614_v60 }
 0x44b   :  { %v3847_v9 = vadd.f32 %v6760_v13, %v3616_v27  ;;  %v3848_v54 = vadd.f32 %v6762_v30, %v3617_v42  ;;  %v3849_v18 = vmax.f32 %v3833_v34, 0.0  ;;  %v3850_v57 = vmax.f32 %v3834_v17, 0.0 }
 0x44c   :  { %v3851_v10 = vmax.f32 %v3835_v59, 0.0  ;;  %v3852_v47 = vmax.f32 %v3836_v7, 0.0  ;;  %v3853_v43 = vmax.f32 %v3837_v29, 0.0  ;;  %v3854_v62 = vmax.f32 %v3838_v19, 0.0 }
 0x44d   :  { %v3855_v23 = vmax.f32 %v3839_v22, 0.0  ;;  %v3856_v49 = vmax.f32 %v3840_v31, 0.0  ;;  %v3857_v26 = vmax.f32 %v3841_v56, 0.0  ;;  %v3858_v14 = vmax.f32 %v3842_v51, 0.0  ;;  %3865 = vst [vmem:[#allocation3] sm:$0xff] %v3849_v18  ;;  %3866 = vst [vmem:[#allocation3 + $0x8] sm:$0xff] %v3850_v57 }
 0x44e   :  { %v3859_v33 = vmax.f32 %v3843_v20, 0.0  ;;  %v3860_v50 = vmax.f32 %v3844_v0, 0.0  ;;  %v3861_v2 = vmax.f32 %v3845_v44, 0.0  ;;  %v3863_v13 = vmax.f32 %v3847_v9, 0.0  ;;  %3867 = vst [vmem:[#allocation3 + $0x10] sm:$0xff] %v3851_v10  ;;  %3868 = vst [vmem:[#allocation3 + $0x18] sm:$0xff] %v3852_v47 }
 0x44f   :  { %3869 = vst [vmem:[#allocation3 + $0x20] sm:$0xff] %v3853_v43  ;;  %3870 = vst [vmem:[#allocation3 + $0x28] sm:$0xff] %v3854_v62  ;;  %v3864_v30 = vmax.f32 %v3848_v54, 0.0 }
 0x450   :  { %3871 = vst [vmem:[#allocation3 + $0x30] sm:$0xff] %v3855_v23  ;;  %3872 = vst [vmem:[#allocation3 + $0x38] sm:$0xff] %v3856_v49 }
 0x451   :  { %3873 = vst [vmem:[#allocation3 + $0x40] sm:$0xff] %v3857_v26  ;;  %3874 = vst [vmem:[#allocation3 + $0x48] sm:$0xff] %v3858_v14 }
 0x452   :  { %3875 = vst [vmem:[#allocation3 + $0x50] sm:$0xff] %v3859_v33  ;;  %3876 = vst [vmem:[#allocation3 + $0x58] sm:$0xff] %v3860_v50 }
 0x453   :  { %3877 = vst [vmem:[#allocation3 + $0x60] sm:$0xff] %v3861_v2  ;;  %3879 = vst [vmem:[#allocation3 + $0x70] sm:$0xff] %v3863_v13 }
 0x454   :  { %3880 = vst [vmem:[#allocation3 + $0x78] sm:$0xff] %v3864_v30 }
 0x455   :  { %4972 = shalt.err (!%p4969_p4)
}
 0x456   :  { %s4973_s21 = scalar_lea.hbm %s6880_s11, 2048 }
 0x457   :  { %p4974_p5 = scmp.ne.s32.totalorder %s6880_s11, %s4973_s21  ;;  %p4977_p6 = scmp.lt.u32.totalorder %s4973_s21, %s6880_s11 }
 0x459   :  { %p4979_p7 = pnand %p4977_p6, %p4974_p5 }
 0x45b   :  { %4982 = shalt.err (!%p4979_p7)
}
 0x45c   :  { %s4987_s0 = smov 128   ;;  %s4988_s25 = smov 8  }
 0x45d   :  { %3892 = dma.vmem_to_hbm [thread:$0]  %s3887_s18, 2048, %s6880_s11, [#allocation4], %s4987_s0, %s4987_s0, %s4988_s25  }
 0x45e   :  { %4983 = dma.done.wait [#allocation4], 2048  }
 0x45f   :  { %4984 = vsyncadd [#allocation4], 4294965248 }
 0x460   :  { %3896 = vsyncpa [#allocation4], 1 }

</bundles_post_ra>
